<compile_context>
chip_gen: v6e
topology: v6e:2x2x1
jax: 0.10.0
libtpu: 0.0.40
codegen_flags: <defaults>
</compile_context>

<pallas_src>
import functools
import math

import jax
import jax.numpy as jnp
from jax.experimental import pallas as pl
from jax.experimental.pallas import tpu as pltpu


def _round_up(x, m):
    return (x + m - 1) // m * m


_VMEM_LIMIT = 32 * 1024 * 1024  # explicit budget; safe on v5e/v6e/v7x


# ----------------------------- attention kernel -----------------------------

def _attention_kernel(q_ref, kv_ref, mask_ref, sumed_ref, confid_ref, *,
                      inv_sqrt_c, nsample):
    # qT: (D, TQ) f32, kvT: (S, D, TQ) f32, maskT: (S, TQ) f32.  Lane axis = TQ.
    qT = q_ref[0]
    maskT = mask_ref[0]

    # scores[k, p] = <q[:, p], corres[k, :, p]> / sqrt(C)  (VPU mul + sublane reduce;
    # q's 3 geo channels are zero-padded so the D contraction equals the C one).
    rows = []
    for k in range(nsample):
        rows.append(jnp.sum(qT * kv_ref[0, k], axis=0, keepdims=True))      # (1, TQ)
    s = jnp.concatenate(rows, axis=0) * inv_sqrt_c                          # (S, TQ)
    s = jnp.where(maskT > 0.0, s, -1e9)

    m = jnp.max(s, axis=0, keepdims=True)                                   # (1, TQ)
    e = jnp.exp(s - m) * maskT
    denom = jnp.sum(e, axis=0, keepdims=True) + 1e-8
    w = e * pl.reciprocal(denom, approx=False)   # exact: confid is a returned weight
    confid_ref[0] = w                                                       # (S, TQ)

    # sumed[:, p] = sum_k w[k, p] * kv[k, :, p]  (VPU broadcast-multiply accumulate)
    acc = w[0:1] * kv_ref[0, 0]                                             # (D, TQ)
    for k in range(1, nsample):
        acc = acc + w[k:k + 1] * kv_ref[0, k]
    sumed_ref[0] = acc


def context_attention(q_pad_t, kv_t, mask_t, c_dim, tq=512):
    """q_pad_t:(B,D,HW), kv_t:(B,S,D,HW), mask_t:(B,S,HW), all f32, lane axis = HW.
    D = C + 3 ([corres|geo]); q is zero-padded over the geo channels.
    Returns sumed_t (B,D,HW) f32 and confid_t (B,S,HW) f32 (still lane = HW)."""
    B, D, HW = q_pad_t.shape
    S = kv_t.shape[1]
    TQ = min(tq, _round_up(HW, 8))
    HWp = _round_up(HW, TQ)
    if HWp != HW:
        pad = HWp - HW
        q_pad_t = jnp.pad(q_pad_t, ((0, 0), (0, 0), (0, pad)))
        kv_t = jnp.pad(kv_t, ((0, 0), (0, 0), (0, 0), (0, pad)))
        mask_t = jnp.pad(mask_t, ((0, 0), (0, 0), (0, pad)))

    kernel = functools.partial(_attention_kernel,
                               inv_sqrt_c=1.0 / math.sqrt(c_dim), nsample=S)
    sumed_t, confid_t = pl.pallas_call(
        kernel,
        out_shape=(jax.ShapeDtypeStruct((B, D, HWp), jnp.float32),
                   jax.ShapeDtypeStruct((B, S, HWp), jnp.float32)),
        grid=(B, HWp // TQ),
        in_specs=[pl.BlockSpec((1, D, TQ), lambda b, i: (b, 0, i)),
                  pl.BlockSpec((1, S, D, TQ), lambda b, i: (b, 0, 0, i)),
                  pl.BlockSpec((1, S, TQ), lambda b, i: (b, 0, i))],
        out_specs=(pl.BlockSpec((1, D, TQ), lambda b, i: (b, 0, i)),
                   pl.BlockSpec((1, S, TQ), lambda b, i: (b, 0, i))),
        compiler_params=pltpu.CompilerParams(
            dimension_semantics=("parallel", "parallel"),
            vmem_limit_bytes=_VMEM_LIMIT),
    )(q_pad_t, kv_t, mask_t)
    return sumed_t[:, :, :HW], confid_t[:, :, :HW]


# ------------------------ fused matmul + BN + act kernel ---------------------

def _matmul_bn_kernel(x_ref, w_ref, scale_ref, bias_ref, *rest,
                      relu, relu_upto, has_res, has_extra, extra_t):
    idx = 0
    res_ref = ew_ref = None
    if has_res:
        res_ref = rest[idx]; idx += 1
    if has_extra:
        ew_ref = rest[idx]; idx += 1
    out_ref = rest[idx]; idx += 1
    out2_ref = rest[idx] if has_extra else None

    y = jnp.dot(x_ref[...], w_ref[...], preferred_element_type=jnp.float32)
    y = y * scale_ref[...] + bias_ref[...]
    if has_res:
        y = y + res_ref[...]
    if relu:
        y = jnp.maximum(y, 0.0)
    elif relu_upto is not None:
        # relu only on the first `relu_upto` output columns (conv1 half of the
        # fused conv1+downsample slab); the downsample half stays linear.
        col = jax.lax.broadcasted_iota(jnp.int32, y.shape, 1)
        y = jnp.where(col < relu_upto, jnp.maximum(y, 0.0), y)
    out_ref[...] = y

    if has_extra:
        yb = y.astype(ew_ref.dtype)          # ew_ref is (N2, N) bf16
        if extra_t:
            # (N2, TM): lane-dense store along TM
            out2_ref[...] = jax.lax.dot_general(
                ew_ref[...], yb, (((1,), (1,)), ((), ())),
                preferred_element_type=jnp.float32)
        else:
            out2_ref[...] = jax.lax.dot_general(
                yb, ew_ref[...], (((1,), (1,)), ((), ())),
                preferred_element_type=jnp.float32)


def matmul_bn_act(x, w, scale, bias, residual=None, relu=False, relu_upto=None,
                  extra_w=None, tm=512):
    """x:(M,K) @ w:(K,N) with fused per-channel scale/bias (folded BN), optional
    residual add, (partial) ReLU and an extra fused projection y@extra_w.
    Batch is folded into M and tiled; operands are bf16, accumulation f32."""
    M, K = x.shape
    N = w.shape[1]
    TM = min(tm, _round_up(M, 8))
    Mp = _round_up(M, TM)
    if Mp // TM < 2 and M > 8:
        # Guarantee >= 2 grid steps so both v7x TensorCores get work.
        TM = _round_up(-(-M // 2), 8)
        Mp = 2 * TM

    xb = x.astype(jnp.bfloat16)
    if Mp != M:
        xb = jnp.pad(xb, ((0, Mp - M), (0, 0)))
    wb = w.astype(jnp.bfloat16)
    scale2 = scale.reshape(1, N).astype(jnp.float32)
    bias2 = bias.reshape(1, N).astype(jnp.float32)

    has_res = residual is not None
    has_extra = extra_w is not None
    # transposed (lane-dense) extra store needs a 128-aligned (or full) lane tile
    extra_t = has_extra and (TM % 128 == 0 or TM == Mp)

    in_specs = [pl.BlockSpec((TM, K), lambda m: (m, 0)),
                pl.BlockSpec((K, N), lambda m: (0, 0)),
                pl.BlockSpec((1, N), lambda m: (0, 0)),
                pl.BlockSpec((1, N), lambda m: (0, 0))]
    args = [xb, wb, scale2, bias2]
    if has_res:
        r = residual.astype(jnp.float32)
        if Mp != M:
            r = jnp.pad(r, ((0, Mp - M), (0, 0)))
        in_specs.append(pl.BlockSpec((TM, N), lambda m: (m, 0)))
        args.append(r)
    if has_extra:
        N2 = extra_w.shape[1]
        ew_t = jnp.transpose(extra_w).astype(jnp.bfloat16)          # (N2, N)
        in_specs.append(pl.BlockSpec((N2, N), lambda m: (0, 0)))
        args.append(ew_t)

    out_shapes = [jax.ShapeDtypeStruct((Mp, N), jnp.float32)]
    out_specs = [pl.BlockSpec((TM, N), lambda m: (m, 0))]
    if has_extra:
        if extra_t:
            out_shapes.append(jax.ShapeDtypeStruct((N2, Mp), jnp.float32))
            out_specs.append(pl.BlockSpec((N2, TM), lambda m: (0, m)))
        else:
            out_shapes.append(jax.ShapeDtypeStruct((Mp, N2), jnp.float32))
            out_specs.append(pl.BlockSpec((TM, N2), lambda m: (m, 0)))

    kernel = functools.partial(_matmul_bn_kernel, relu=relu, relu_upto=relu_upto,
                               has_res=has_res, has_extra=has_extra,
                               extra_t=extra_t)
    outs = pl.pallas_call(
        kernel,
        out_shape=tuple(out_shapes),
        grid=(Mp // TM,),
        in_specs=in_specs,
        out_specs=tuple(out_specs),
        compiler_params=pltpu.CompilerParams(
            dimension_semantics=("parallel",),
            vmem_limit_bytes=_VMEM_LIMIT),
    )(*args)

    if not has_extra:
        out = outs[0] if isinstance(outs, (tuple, list)) else outs
        return out[:M]
    out, out2 = outs
    out2 = out2[:, :M].T if extra_t else out2[:M]
    return out[:M], out2


# ------------------------- conv / BasicBlock glue ---------------------------

def fold_bn(bn, eps=1e-5):
    scale = bn["gamma"] / jnp.sqrt(bn["var"] + eps)
    bias = bn["beta"] - bn["mean"] * scale
    return scale, bias


def im2col3x3(x):  # x: (B, H, W, C), padding=1, stride=1 -> (B*H*W, 9*C)
    # TODO(synk): fuse the 9-tap im2col into the matmul kernel (tap grid axis
    # over a halo-padded activation) to avoid the materialized intermediate.
    B, H, W, C = x.shape
    xp = jnp.pad(x, ((0, 0), (1, 1), (1, 1), (0, 0)))
    cols = [xp[:, dy:dy + H, dx:dx + W, :] for dy in range(3) for dx in range(3)]
    col = jnp.stack(cols, axis=3)                   # (B, H, W, 9, C)
    return col.reshape(B * H * W, 9 * C)


def basic_block(x_bhwc, p, extra_w=None):
    """BasicBlock: relu(bn2(conv2(relu(bn1(conv1(x))))) + downsample(x)).
    conv1+bn1+relu and downsample(1x1)+BN are fused in one matmul (the centre
    im2col tap IS x).  If extra_w is given, also returns (out @ extra_w) fused
    in the conv2 kernel's epilogue."""
    B, H, W, Cin = x_bhwc.shape
    planes = p["conv1_w"].shape[0]
    M = B * H * W
    s1, b1 = fold_bn(p["bn1"])
    s2, b2 = fold_bn(p["bn2"])
    sd, bd = fold_bn(p["down_bn"])

    # combined conv1 + downsample weight: (9*Cin, 2*planes)
    w1 = jnp.transpose(p["conv1_w"], (2, 3, 1, 0)).reshape(9 * Cin, planes)
    wd = jnp.transpose(p["down_w"][:, :, 0, 0], (1, 0))                 # (Cin, planes)
    wdf = jnp.zeros((9 * Cin, planes), wd.dtype).at[4 * Cin:5 * Cin].set(wd)
    w_comb = jnp.concatenate([w1, wdf], axis=1)                         # (9Cin, 2p)
    s_comb = jnp.concatenate([s1, sd])
    b_comb = jnp.concatenate([b1, bd])

    cols1 = im2col3x3(x_bhwc.astype(jnp.bfloat16))                      # bf16 im2col
    hres = matmul_bn_act(cols1, w_comb, s_comb, b_comb, relu_upto=planes)
    h, res = hres[:, :planes], hres[:, planes:]

    # conv2 + bn2 + residual + relu (+ optional fused out_conv projection)
    w2 = jnp.transpose(p["conv2_w"], (2, 3, 1, 0)).reshape(9 * planes, planes)
    cols2 = im2col3x3(h.reshape(B, H, W, planes).astype(jnp.bfloat16))
    if extra_w is None:
        out = matmul_bn_act(cols2, w2, s2, b2, residual=res, relu=True)
        return out.reshape(B, H, W, planes)
    out, extra = matmul_bn_act(cols2, w2, s2, b2, residual=res, relu=True,
                               extra_w=extra_w)
    return out.reshape(B, H, W, planes), extra.reshape(B, H, W, extra_w.shape[1])


# ----------------------------- QueryAndGroup --------------------------------

def query_and_group(xyz, new_xyz, features, radius, nsample):
    """Ball query + grouping (plain-JAX glue: data-dependent gather).
    xyz:(B,N,3) new_xyz:(B,M,3) features:(B,Cf,N)
    -> grouped_xyz (B,M,S,3), grouped_feat (B,M,S,Cf), mask (B,M,S)"""
    # TODO(synk): original relocal QueryAndGroup is a CUDA ball_query/group_points
    # op with an appended validity-mask channel; replicated here with lax.top_k.
    B, N, _ = xyz.shape
    sqd = jnp.sum((new_xyz[:, :, None, :] - xyz[:, None, :, :]) ** 2, axis=-1)  # (B,M,N)
    within = sqd <= radius * radius
    arange = jnp.arange(N)[None, None, :]
    key = jnp.where(within, arange, N + arange)           # in-ball points first, by index
    _, idx = jax.lax.top_k(-key, nsample)                 # nsample smallest keys (B,M,S)
    valid = jnp.take_along_axis(within, idx, axis=-1)
    idx = jnp.where(valid, idx, idx[..., :1])             # pad with first neighbour
    grouped_xyz = jax.vmap(lambda pts, i: pts[i])(xyz, idx)                     # (B,M,S,3)
    feats_nlc = jnp.transpose(features, (0, 2, 1))                              # (B,N,Cf)
    grouped_feat = jax.vmap(lambda f, i: f[i])(feats_nlc, idx)                  # (B,M,S,Cf)
    return grouped_xyz, grouped_feat, valid.astype(jnp.float32)


# ------------------------------ RefineLayer ----------------------------------

def refine_layer_forward(params, xyz, new_xyz, features, query_img_feat, pre_feat,
                         query_X_world, radius, nsample):
    B, C, H, W = query_img_feat.shape
    HW = H * W

    # grouper: new_features = [xyz(3), features(2C), mask(1)] channel layout
    geo, grouped_feat, mask = query_and_group(xyz, new_xyz, features, radius, nsample)
    corres = grouped_feat[..., :C]                        # channels 3:3+C of new_features

    # ContextAttention (Pallas): masked dot-product attention over nsample.
    # TODO(synk): ContextAttention source not provided upstream; implemented as
    # q.corres/sqrt(C) masked softmax producing weighted sums of [corres, geo].
    # Channels-first (lane = HW) layouts for the kernel (layout plumbing only).
    kv_t = jnp.concatenate(
        [jnp.transpose(corres, (0, 2, 3, 1)),             # (B,S,C,HW)
         jnp.transpose(geo, (0, 2, 3, 1))], axis=2).astype(jnp.float32)  # (B,S,C+3,HW)
    mask_t = jnp.transpose(mask, (0, 2, 1))                              # (B,S,HW)
    q_t = query_img_feat.reshape(B, C, HW)
    q_pad_t = jnp.concatenate([q_t, jnp.zeros((B, 3, HW), q_t.dtype)],
                              axis=1).astype(jnp.float32)                # (B,C+3,HW)
    sumed_t, confid_t = context_attention(q_pad_t, kv_t, mask_t, C)      # (B,C+3,HW),(B,S,HW)

    # GT soft-assignment weights (top-8 nearest by L2), plain JAX glue.
    qx = jnp.transpose(query_X_world.reshape(B, 3, HW), (0, 2, 1))       # (B,HW,3)
    dist = jnp.sqrt(jnp.sum((qx[:, :, None, :] - geo) ** 2, axis=-1))    # (B,HW,S)
    _, idx_topk = jax.lax.top_k(-dist, 8)
    weights_all_gt = jnp.sum(jax.nn.one_hot(idx_topk, nsample, dtype=dist.dtype), axis=-2)
    weights_all = jnp.transpose(confid_t, (0, 2, 1))[:, None]            # (B,1,HW,S)

    # is_final == False path
    qf = jnp.transpose(query_img_feat, (0, 2, 3, 1))
    pf = jnp.transpose(pre_feat, (0, 2, 3, 1))
    fused = basic_block(jnp.concatenate([qf, pf], axis=-1), params["fusion"])   # (B,H,W,C)

    sumed_map = jnp.transpose(sumed_t, (0, 2, 1)).reshape(B, H, W, C + 3)
    wo = jnp.transpose(params["out_conv_w"][:, :, 0, 0], (1, 0))                # (C,3)
    feat, refined = basic_block(jnp.concatenate([fused, sumed_map], axis=-1),
                                params["res_blocks"], extra_w=wo)               # (B,H,W,C),(B,H,W,3)

    refined_xyz = jnp.transpose(refined, (0, 3, 1, 2))                          # (B,3,H,W)
    feat_nchw = jnp.transpose(feat, (0, 3, 1, 2))                               # (B,C,H,W)
    return refined_xyz, feat_nchw, weights_all, weights_all_gt


# --------------------------- deterministic parameters ------------------------

def init_bn(key, c):
    k1, k2, k3, k4 = jax.random.split(key, 4)
    return dict(gamma=1.0 + 0.1 * jax.random.normal(k1, (c,)),
                beta=0.1 * jax.random.normal(k2, (c,)),
                mean=0.1 * jax.random.normal(k3, (c,)),
                var=1.0 + 0.1 * jax.random.uniform(k4, (c,)))


def init_basic_block(key, inplanes, planes):
    ks = jax.random.split(key, 6)
    return dict(conv1_w=0.05 * jax.random.normal(ks[0], (planes, inplanes, 3, 3)),
                bn1=init_bn(ks[1], planes),
                conv2_w=0.05 * jax.random.normal(ks[2], (planes, planes, 3, 3)),
                bn2=init_bn(ks[3], planes),
                down_w=0.05 * jax.random.normal(ks[4], (planes, inplanes, 1, 1)),
                down_bn=init_bn(ks[5], planes))


# ------------------------------------ main -----------------------------------

if __name__ == "__main__":
    B, C_rgb, C_pre = 2, 32, 32          # rgb_planes / pre_planes (small synthetic)
    H = W = 8
    N_pts = 128
    nsample = 16
    radius = 0.9

    key = jax.random.PRNGKey(0)
    keys = jax.random.split(key, 9)
    xyz = jax.random.uniform(keys[0], (B, N_pts, 3), minval=-1.0, maxval=1.0)
    new_xyz = jax.random.uniform(keys[1], (B, H * W, 3), minval=-1.0, maxval=1.0)
    features = jax.random.normal(keys[2], (B, 2 * C_rgb, N_pts))
    query_img_feat = jax.random.normal(keys[3], (B, C_rgb, H, W))
    pre_feat = jax.random.normal(keys[4], (B, C_pre, H, W))
    query_X_world = jax.random.uniform(keys[5], (B, 3, H, W), minval=-1.0, maxval=1.0)

    params = dict(
        fusion=init_basic_block(keys[6], C_rgb + C_pre, C_rgb),
        res_blocks=init_basic_block(keys[7], C_rgb + C_rgb + 3, C_rgb),
        out_conv_w=0.05 * jax.random.normal(keys[8], (3, C_rgb, 1, 1)),
    )

    outs = refine_layer_forward(params, xyz, new_xyz, features, query_img_feat,
                                pre_feat, query_X_world, radius, nsample)
    outs = jax.block_until_ready(outs)
    refined_xyz, feat, weights_all, weights_all_gt = outs

    assert refined_xyz.shape == (B, 3, H, W)
    assert feat.shape == (B, C_rgb, H, W)
    assert weights_all.shape == (B, 1, H * W, nsample)
    assert weights_all_gt.shape == (B, H * W, nsample)
    assert all(bool(jnp.isfinite(o).all()) for o in outs)
    print("KERNEL_OK")
</pallas_src>

<mosaic_0001>
module attributes {stable_mosaic.version = 11 : i64} {
  func.func @_attention_kernel(%arg0: i32, %arg1: i32, %arg2: memref<1x35x64xf32, #tpu.memory_space<vmem>>, %arg3: memref<1x16x35x64xf32, #tpu.memory_space<vmem>>, %arg4: memref<1x16x64xf32, #tpu.memory_space<vmem>>, %arg5: memref<1x35x64xf32, #tpu.memory_space<vmem>>, %arg6: memref<1x16x64xf32, #tpu.memory_space<vmem>>) attributes {dimension_semantics = [#tpu.dimension_semantics<parallel>, #tpu.dimension_semantics<parallel>], iteration_bounds = array<i64: 2, 1>, scalar_prefetch = 0 : i64, scratch_operands = 0 : i64, tpu.core_type = #tpu.core_type<tc>, window_params = [{transform_indices = @transform_0, window_bounds = array<i64: 1, 35, 64>}, {transform_indices = @transform_1, window_bounds = array<i64: 1, 16, 35, 64>}, {transform_indices = @transform_2, window_bounds = array<i64: 1, 16, 64>}, {transform_indices = @transform_3, window_bounds = array<i64: 1, 35, 64>}, {transform_indices = @transform_4, window_bounds = array<i64: 1, 16, 64>}]} {
    %c0 = arith.constant 0 : index
    %c0_0 = arith.constant 0 : index
    %c0_1 = arith.constant 0 : index
    %0 = vector.load %arg2[%c0, %c0_0, %c0_1] : memref<1x35x64xf32, #tpu.memory_space<vmem>>, vector<1x35x64xf32>
    %1 = vector.shape_cast %0 : vector<1x35x64xf32> to vector<35x64xf32>
    %c0_2 = arith.constant 0 : index
    %c0_3 = arith.constant 0 : index
    %c0_4 = arith.constant 0 : index
    %2 = vector.load %arg4[%c0_2, %c0_3, %c0_4] : memref<1x16x64xf32, #tpu.memory_space<vmem>>, vector<1x16x64xf32>
    %3 = vector.shape_cast %2 : vector<1x16x64xf32> to vector<16x64xf32>
    %c0_5 = arith.constant 0 : index
    %c0_6 = arith.constant 0 : index
    %c0_7 = arith.constant 0 : index
    %c0_8 = arith.constant 0 : index
    %4 = vector.load %arg3[%c0_5, %c0_6, %c0_7, %c0_8] : memref<1x16x35x64xf32, #tpu.memory_space<vmem>>, vector<1x1x35x64xf32>
    %5 = vector.shape_cast %4 : vector<1x1x35x64xf32> to vector<35x64xf32>
    %6 = arith.mulf %1, %5 : vector<35x64xf32>
    %cst = arith.constant dense<0.000000e+00> : vector<64xf32>
    %7 = vector.multi_reduction <add>, %6, %cst [0] : vector<35x64xf32> to vector<64xf32>
    %8 = vector.shape_cast %7 : vector<64xf32> to vector<1x64xf32>
    %c0_9 = arith.constant 0 : index
    %c1 = arith.constant 1 : index
    %c0_10 = arith.constant 0 : index
    %c0_11 = arith.constant 0 : index
    %9 = vector.load %arg3[%c0_9, %c1, %c0_10, %c0_11] : memref<1x16x35x64xf32, #tpu.memory_space<vmem>>, vector<1x1x35x64xf32>
    %10 = vector.shape_cast %9 : vector<1x1x35x64xf32> to vector<35x64xf32>
    %11 = arith.mulf %1, %10 : vector<35x64xf32>
    %cst_12 = arith.constant dense<0.000000e+00> : vector<64xf32>
    %12 = vector.multi_reduction <add>, %11, %cst_12 [0] : vector<35x64xf32> to vector<64xf32>
    %13 = vector.shape_cast %12 : vector<64xf32> to vector<1x64xf32>
    %c0_13 = arith.constant 0 : index
    %c2 = arith.constant 2 : index
    %c0_14 = arith.constant 0 : index
    %c0_15 = arith.constant 0 : index
    %14 = vector.load %arg3[%c0_13, %c2, %c0_14, %c0_15] : memref<1x16x35x64xf32, #tpu.memory_space<vmem>>, vector<1x1x35x64xf32>
    %15 = vector.shape_cast %14 : vector<1x1x35x64xf32> to vector<35x64xf32>
    %16 = arith.mulf %1, %15 : vector<35x64xf32>
    %cst_16 = arith.constant dense<0.000000e+00> : vector<64xf32>
    %17 = vector.multi_reduction <add>, %16, %cst_16 [0] : vector<35x64xf32> to vector<64xf32>
    %18 = vector.shape_cast %17 : vector<64xf32> to vector<1x64xf32>
    %c0_17 = arith.constant 0 : index
    %c3 = arith.constant 3 : index
    %c0_18 = arith.constant 0 : index
    %c0_19 = arith.constant 0 : index
    %19 = vector.load %arg3[%c0_17, %c3, %c0_18, %c0_19] : memref<1x16x35x64xf32, #tpu.memory_space<vmem>>, vector<1x1x35x64xf32>
    %20 = vector.shape_cast %19 : vector<1x1x35x64xf32> to vector<35x64xf32>
    %21 = arith.mulf %1, %20 : vector<35x64xf32>
    %cst_20 = arith.constant dense<0.000000e+00> : vector<64xf32>
    %22 = vector.multi_reduction <add>, %21, %cst_20 [0] : vector<35x64xf32> to vector<64xf32>
    %23 = vector.shape_cast %22 : vector<64xf32> to vector<1x64xf32>
    %c0_21 = arith.constant 0 : index
    %c4 = arith.constant 4 : index
    %c0_22 = arith.constant 0 : index
    %c0_23 = arith.constant 0 : index
    %24 = vector.load %arg3[%c0_21, %c4, %c0_22, %c0_23] : memref<1x16x35x64xf32, #tpu.memory_space<vmem>>, vector<1x1x35x64xf32>
    %25 = vector.shape_cast %24 : vector<1x1x35x64xf32> to vector<35x64xf32>
    %26 = arith.mulf %1, %25 : vector<35x64xf32>
    %cst_24 = arith.constant dense<0.000000e+00> : vector<64xf32>
    %27 = vector.multi_reduction <add>, %26, %cst_24 [0] : vector<35x64xf32> to vector<64xf32>
    %28 = vector.shape_cast %27 : vector<64xf32> to vector<1x64xf32>
    %c0_25 = arith.constant 0 : index
    %c5 = arith.constant 5 : index
    %c0_26 = arith.constant 0 : index
    %c0_27 = arith.constant 0 : index
    %29 = vector.load %arg3[%c0_25, %c5, %c0_26, %c0_27] : memref<1x16x35x64xf32, #tpu.memory_space<vmem>>, vector<1x1x35x64xf32>
    %30 = vector.shape_cast %29 : vector<1x1x35x64xf32> to vector<35x64xf32>
    %31 = arith.mulf %1, %30 : vector<35x64xf32>
    %cst_28 = arith.constant dense<0.000000e+00> : vector<64xf32>
    %32 = vector.multi_reduction <add>, %31, %cst_28 [0] : vector<35x64xf32> to vector<64xf32>
    %33 = vector.shape_cast %32 : vector<64xf32> to vector<1x64xf32>
    %c0_29 = arith.constant 0 : index
    %c6 = arith.constant 6 : index
    %c0_30 = arith.constant 0 : index
    %c0_31 = arith.constant 0 : index
    %34 = vector.load %arg3[%c0_29, %c6, %c0_30, %c0_31] : memref<1x16x35x64xf32, #tpu.memory_space<vmem>>, vector<1x1x35x64xf32>
    %35 = vector.shape_cast %34 : vector<1x1x35x64xf32> to vector<35x64xf32>
    %36 = arith.mulf %1, %35 : vector<35x64xf32>
    %cst_32 = arith.constant dense<0.000000e+00> : vector<64xf32>
    %37 = vector.multi_reduction <add>, %36, %cst_32 [0] : vector<35x64xf32> to vector<64xf32>
    %38 = vector.shape_cast %37 : vector<64xf32> to vector<1x64xf32>
    %c0_33 = arith.constant 0 : index
    %c7 = arith.constant 7 : index
    %c0_34 = arith.constant 0 : index
    %c0_35 = arith.constant 0 : index
    %39 = vector.load %arg3[%c0_33, %c7, %c0_34, %c0_35] : memref<1x16x35x64xf32, #tpu.memory_space<vmem>>, vector<1x1x35x64xf32>
    %40 = vector.shape_cast %39 : vector<1x1x35x64xf32> to vector<35x64xf32>
    %41 = arith.mulf %1, %40 : vector<35x64xf32>
    %cst_36 = arith.constant dense<0.000000e+00> : vector<64xf32>
    %42 = vector.multi_reduction <add>, %41, %cst_36 [0] : vector<35x64xf32> to vector<64xf32>
    %43 = vector.shape_cast %42 : vector<64xf32> to vector<1x64xf32>
    %c0_37 = arith.constant 0 : index
    %c8 = arith.constant 8 : index
    %c0_38 = arith.constant 0 : index
    %c0_39 = arith.constant 0 : index
    %44 = vector.load %arg3[%c0_37, %c8, %c0_38, %c0_39] : memref<1x16x35x64xf32, #tpu.memory_space<vmem>>, vector<1x1x35x64xf32>
    %45 = vector.shape_cast %44 : vector<1x1x35x64xf32> to vector<35x64xf32>
    %46 = arith.mulf %1, %45 : vector<35x64xf32>
    %cst_40 = arith.constant dense<0.000000e+00> : vector<64xf32>
    %47 = vector.multi_reduction <add>, %46, %cst_40 [0] : vector<35x64xf32> to vector<64xf32>
    %48 = vector.shape_cast %47 : vector<64xf32> to vector<1x64xf32>
    %c0_41 = arith.constant 0 : index
    %c9 = arith.constant 9 : index
    %c0_42 = arith.constant 0 : index
    %c0_43 = arith.constant 0 : index
    %49 = vector.load %arg3[%c0_41, %c9, %c0_42, %c0_43] : memref<1x16x35x64xf32, #tpu.memory_space<vmem>>, vector<1x1x35x64xf32>
    %50 = vector.shape_cast %49 : vector<1x1x35x64xf32> to vector<35x64xf32>
    %51 = arith.mulf %1, %50 : vector<35x64xf32>
    %cst_44 = arith.constant dense<0.000000e+00> : vector<64xf32>
    %52 = vector.multi_reduction <add>, %51, %cst_44 [0] : vector<35x64xf32> to vector<64xf32>
    %53 = vector.shape_cast %52 : vector<64xf32> to vector<1x64xf32>
    %c0_45 = arith.constant 0 : index
    %c10 = arith.constant 10 : index
    %c0_46 = arith.constant 0 : index
    %c0_47 = arith.constant 0 : index
    %54 = vector.load %arg3[%c0_45, %c10, %c0_46, %c0_47] : memref<1x16x35x64xf32, #tpu.memory_space<vmem>>, vector<1x1x35x64xf32>
    %55 = vector.shape_cast %54 : vector<1x1x35x64xf32> to vector<35x64xf32>
    %56 = arith.mulf %1, %55 : vector<35x64xf32>
    %cst_48 = arith.constant dense<0.000000e+00> : vector<64xf32>
    %57 = vector.multi_reduction <add>, %56, %cst_48 [0] : vector<35x64xf32> to vector<64xf32>
    %58 = vector.shape_cast %57 : vector<64xf32> to vector<1x64xf32>
    %c0_49 = arith.constant 0 : index
    %c11 = arith.constant 11 : index
    %c0_50 = arith.constant 0 : index
    %c0_51 = arith.constant 0 : index
    %59 = vector.load %arg3[%c0_49, %c11, %c0_50, %c0_51] : memref<1x16x35x64xf32, #tpu.memory_space<vmem>>, vector<1x1x35x64xf32>
    %60 = vector.shape_cast %59 : vector<1x1x35x64xf32> to vector<35x64xf32>
    %61 = arith.mulf %1, %60 : vector<35x64xf32>
    %cst_52 = arith.constant dense<0.000000e+00> : vector<64xf32>
    %62 = vector.multi_reduction <add>, %61, %cst_52 [0] : vector<35x64xf32> to vector<64xf32>
    %63 = vector.shape_cast %62 : vector<64xf32> to vector<1x64xf32>
    %c0_53 = arith.constant 0 : index
    %c12 = arith.constant 12 : index
    %c0_54 = arith.constant 0 : index
    %c0_55 = arith.constant 0 : index
    %64 = vector.load %arg3[%c0_53, %c12, %c0_54, %c0_55] : memref<1x16x35x64xf32, #tpu.memory_space<vmem>>, vector<1x1x35x64xf32>
    %65 = vector.shape_cast %64 : vector<1x1x35x64xf32> to vector<35x64xf32>
    %66 = arith.mulf %1, %65 : vector<35x64xf32>
    %cst_56 = arith.constant dense<0.000000e+00> : vector<64xf32>
    %67 = vector.multi_reduction <add>, %66, %cst_56 [0] : vector<35x64xf32> to vector<64xf32>
    %68 = vector.shape_cast %67 : vector<64xf32> to vector<1x64xf32>
    %c0_57 = arith.constant 0 : index
    %c13 = arith.constant 13 : index
    %c0_58 = arith.constant 0 : index
    %c0_59 = arith.constant 0 : index
    %69 = vector.load %arg3[%c0_57, %c13, %c0_58, %c0_59] : memref<1x16x35x64xf32, #tpu.memory_space<vmem>>, vector<1x1x35x64xf32>
    %70 = vector.shape_cast %69 : vector<1x1x35x64xf32> to vector<35x64xf32>
    %71 = arith.mulf %1, %70 : vector<35x64xf32>
    %cst_60 = arith.constant dense<0.000000e+00> : vector<64xf32>
    %72 = vector.multi_reduction <add>, %71, %cst_60 [0] : vector<35x64xf32> to vector<64xf32>
    %73 = vector.shape_cast %72 : vector<64xf32> to vector<1x64xf32>
    %c0_61 = arith.constant 0 : index
    %c14 = arith.constant 14 : index
    %c0_62 = arith.constant 0 : index
    %c0_63 = arith.constant 0 : index
    %74 = vector.load %arg3[%c0_61, %c14, %c0_62, %c0_63] : memref<1x16x35x64xf32, #tpu.memory_space<vmem>>, vector<1x1x35x64xf32>
    %75 = vector.shape_cast %74 : vector<1x1x35x64xf32> to vector<35x64xf32>
    %76 = arith.mulf %1, %75 : vector<35x64xf32>
    %cst_64 = arith.constant dense<0.000000e+00> : vector<64xf32>
    %77 = vector.multi_reduction <add>, %76, %cst_64 [0] : vector<35x64xf32> to vector<64xf32>
    %78 = vector.shape_cast %77 : vector<64xf32> to vector<1x64xf32>
    %c0_65 = arith.constant 0 : index
    %c15 = arith.constant 15 : index
    %c0_66 = arith.constant 0 : index
    %c0_67 = arith.constant 0 : index
    %79 = vector.load %arg3[%c0_65, %c15, %c0_66, %c0_67] : memref<1x16x35x64xf32, #tpu.memory_space<vmem>>, vector<1x1x35x64xf32>
    %80 = vector.shape_cast %79 : vector<1x1x35x64xf32> to vector<35x64xf32>
    %81 = arith.mulf %1, %80 : vector<35x64xf32>
    %cst_68 = arith.constant dense<0.000000e+00> : vector<64xf32>
    %82 = vector.multi_reduction <add>, %81, %cst_68 [0] : vector<35x64xf32> to vector<64xf32>
    %83 = vector.shape_cast %82 : vector<64xf32> to vector<1x64xf32>
    %84 = tpu.concatenate %8, %13, %18, %23, %28, %33, %38, %43, %48, %53, %58, %63, %68, %73, %78, %83 in 0 : vector<1x64xf32>, vector<1x64xf32>, vector<1x64xf32>, vector<1x64xf32>, vector<1x64xf32>, vector<1x64xf32>, vector<1x64xf32>, vector<1x64xf32>, vector<1x64xf32>, vector<1x64xf32>, vector<1x64xf32>, vector<1x64xf32>, vector<1x64xf32>, vector<1x64xf32>, vector<1x64xf32>, vector<1x64xf32> -> vector<16x64xf32>
    %cst_69 = arith.constant 0.176776692 : f32
    %85 = vector.broadcast %cst_69 : f32 to vector<16x64xf32>
    %86 = arith.mulf %84, %85 : vector<16x64xf32>
    %cst_70 = arith.constant 0.000000e+00 : f32
    %87 = vector.broadcast %cst_70 : f32 to vector<16x64xf32>
    %88 = arith.cmpf ogt, %3, %87 : vector<16x64xf32>
    %cst_71 = arith.constant -1.000000e+09 : f32
    %89 = vector.broadcast %cst_71 : f32 to vector<16x64xf32>
    %90 = arith.select %88, %86, %89 : vector<16x64xi1>, vector<16x64xf32>
    %cst_72 = arith.constant dense<0xFF800000> : vector<64xf32>
    %91 = vector.multi_reduction <maximumf>, %90, %cst_72 [0] : vector<16x64xf32> to vector<64xf32>
    %92 = vector.shape_cast %91 : vector<64xf32> to vector<1x64xf32>
    %93 = vector.broadcast %92 : vector<1x64xf32> to vector<16x64xf32>
    %94 = arith.subf %90, %93 : vector<16x64xf32>
    %95 = math.exp %94 : vector<16x64xf32>
    %96 = arith.mulf %95, %3 : vector<16x64xf32>
    %cst_73 = arith.constant dense<0.000000e+00> : vector<64xf32>
    %97 = vector.multi_reduction <add>, %96, %cst_73 [0] : vector<16x64xf32> to vector<64xf32>
    %98 = vector.shape_cast %97 : vector<64xf32> to vector<1x64xf32>
    %cst_74 = arith.constant 9.99999993E-9 : f32
    %99 = vector.broadcast %cst_74 : f32 to vector<1x64xf32>
    %100 = arith.addf %98, %99 : vector<1x64xf32>
    %101 = tpu.reciprocal %100 : vector<1x64xf32> -> vector<1x64xf32>
    %102 = vector.broadcast %101 : vector<1x64xf32> to vector<16x64xf32>
    %103 = arith.mulf %96, %102 : vector<16x64xf32>
    %c0_75 = arith.constant 0 : index
    %c0_76 = arith.constant 0 : index
    %c0_77 = arith.constant 0 : index
    %104 = vector.load %arg6[%c0_75, %c0_76, %c0_77] : memref<1x16x64xf32, #tpu.memory_space<vmem>>, vector<1x16x64xf32>
    %105 = vector.shape_cast %104 : vector<1x16x64xf32> to vector<16x64xf32>
    %106 = vector.shape_cast %103 : vector<16x64xf32> to vector<1x16x64xf32>
    tpu.vector_store %arg6[%c0_75, %c0_76, %c0_77], %106 {strides = array<i32>} : memref<1x16x64xf32, #tpu.memory_space<vmem>>, vector<1x16x64xf32>,
    %107 = vector.extract_strided_slice %103 {offsets = [0, 0], sizes = [1, 64], strides = [1, 1]} : vector<16x64xf32> to vector<1x64xf32>
    %c0_78 = arith.constant 0 : index
    %c0_79 = arith.constant 0 : index
    %c0_80 = arith.constant 0 : index
    %c0_81 = arith.constant 0 : index
    %108 = vector.load %arg3[%c0_78, %c0_79, %c0_80, %c0_81] : memref<1x16x35x64xf32, #tpu.memory_space<vmem>>, vector<1x1x35x64xf32>
    %109 = vector.shape_cast %108 : vector<1x1x35x64xf32> to vector<35x64xf32>
    %110 = vector.broadcast %107 : vector<1x64xf32> to vector<35x64xf32>
    %111 = arith.mulf %110, %109 : vector<35x64xf32>
    %112 = vector.extract_strided_slice %103 {offsets = [1, 0], sizes = [1, 64], strides = [1, 1]} : vector<16x64xf32> to vector<1x64xf32>
    %c0_82 = arith.constant 0 : index
    %c1_83 = arith.constant 1 : index
    %c0_84 = arith.constant 0 : index
    %c0_85 = arith.constant 0 : index
    %113 = vector.load %arg3[%c0_82, %c1_83, %c0_84, %c0_85] : memref<1x16x35x64xf32, #tpu.memory_space<vmem>>, vector<1x1x35x64xf32>
    %114 = vector.shape_cast %113 : vector<1x1x35x64xf32> to vector<35x64xf32>
    %115 = vector.broadcast %112 : vector<1x64xf32> to vector<35x64xf32>
    %116 = arith.mulf %115, %114 : vector<35x64xf32>
    %117 = arith.addf %111, %116 : vector<35x64xf32>
    %118 = vector.extract_strided_slice %103 {offsets = [2, 0], sizes = [1, 64], strides = [1, 1]} : vector<16x64xf32> to vector<1x64xf32>
    %c0_86 = arith.constant 0 : index
    %c2_87 = arith.constant 2 : index
    %c0_88 = arith.constant 0 : index
    %c0_89 = arith.constant 0 : index
    %119 = vector.load %arg3[%c0_86, %c2_87, %c0_88, %c0_89] : memref<1x16x35x64xf32, #tpu.memory_space<vmem>>, vector<1x1x35x64xf32>
    %120 = vector.shape_cast %119 : vector<1x1x35x64xf32> to vector<35x64xf32>
    %121 = vector.broadcast %118 : vector<1x64xf32> to vector<35x64xf32>
    %122 = arith.mulf %121, %120 : vector<35x64xf32>
    %123 = arith.addf %117, %122 : vector<35x64xf32>
    %124 = vector.extract_strided_slice %103 {offsets = [3, 0], sizes = [1, 64], strides = [1, 1]} : vector<16x64xf32> to vector<1x64xf32>
    %c0_90 = arith.constant 0 : index
    %c3_91 = arith.constant 3 : index
    %c0_92 = arith.constant 0 : index
    %c0_93 = arith.constant 0 : index
    %125 = vector.load %arg3[%c0_90, %c3_91, %c0_92, %c0_93] : memref<1x16x35x64xf32, #tpu.memory_space<vmem>>, vector<1x1x35x64xf32>
    %126 = vector.shape_cast %125 : vector<1x1x35x64xf32> to vector<35x64xf32>
    %127 = vector.broadcast %124 : vector<1x64xf32> to vector<35x64xf32>
    %128 = arith.mulf %127, %126 : vector<35x64xf32>
    %129 = arith.addf %123, %128 : vector<35x64xf32>
    %130 = vector.extract_strided_slice %103 {offsets = [4, 0], sizes = [1, 64], strides = [1, 1]} : vector<16x64xf32> to vector<1x64xf32>
    %c0_94 = arith.constant 0 : index
    %c4_95 = arith.constant 4 : index
    %c0_96 = arith.constant 0 : index
    %c0_97 = arith.constant 0 : index
    %131 = vector.load %arg3[%c0_94, %c4_95, %c0_96, %c0_97] : memref<1x16x35x64xf32, #tpu.memory_space<vmem>>, vector<1x1x35x64xf32>
    %132 = vector.shape_cast %131 : vector<1x1x35x64xf32> to vector<35x64xf32>
    %133 = vector.broadcast %130 : vector<1x64xf32> to vector<35x64xf32>
    %134 = arith.mulf %133, %132 : vector<35x64xf32>
    %135 = arith.addf %129, %134 : vector<35x64xf32>
    %136 = vector.extract_strided_slice %103 {offsets = [5, 0], sizes = [1, 64], strides = [1, 1]} : vector<16x64xf32> to vector<1x64xf32>
    %c0_98 = arith.constant 0 : index
    %c5_99 = arith.constant 5 : index
    %c0_100 = arith.constant 0 : index
    %c0_101 = arith.constant 0 : index
    %137 = vector.load %arg3[%c0_98, %c5_99, %c0_100, %c0_101] : memref<1x16x35x64xf32, #tpu.memory_space<vmem>>, vector<1x1x35x64xf32>
    %138 = vector.shape_cast %137 : vector<1x1x35x64xf32> to vector<35x64xf32>
    %139 = vector.broadcast %136 : vector<1x64xf32> to vector<35x64xf32>
    %140 = arith.mulf %139, %138 : vector<35x64xf32>
    %141 = arith.addf %135, %140 : vector<35x64xf32>
    %142 = vector.extract_strided_slice %103 {offsets = [6, 0], sizes = [1, 64], strides = [1, 1]} : vector<16x64xf32> to vector<1x64xf32>
    %c0_102 = arith.constant 0 : index
    %c6_103 = arith.constant 6 : index
    %c0_104 = arith.constant 0 : index
    %c0_105 = arith.constant 0 : index
    %143 = vector.load %arg3[%c0_102, %c6_103, %c0_104, %c0_105] : memref<1x16x35x64xf32, #tpu.memory_space<vmem>>, vector<1x1x35x64xf32>
    %144 = vector.shape_cast %143 : vector<1x1x35x64xf32> to vector<35x64xf32>
    %145 = vector.broadcast %142 : vector<1x64xf32> to vector<35x64xf32>
    %146 = arith.mulf %145, %144 : vector<35x64xf32>
    %147 = arith.addf %141, %146 : vector<35x64xf32>
    %148 = vector.extract_strided_slice %103 {offsets = [7, 0], sizes = [1, 64], strides = [1, 1]} : vector<16x64xf32> to vector<1x64xf32>
    %c0_106 = arith.constant 0 : index
    %c7_107 = arith.constant 7 : index
    %c0_108 = arith.constant 0 : index
    %c0_109 = arith.constant 0 : index
    %149 = vector.load %arg3[%c0_106, %c7_107, %c0_108, %c0_109] : memref<1x16x35x64xf32, #tpu.memory_space<vmem>>, vector<1x1x35x64xf32>
    %150 = vector.shape_cast %149 : vector<1x1x35x64xf32> to vector<35x64xf32>
    %151 = vector.broadcast %148 : vector<1x64xf32> to vector<35x64xf32>
    %152 = arith.mulf %151, %150 : vector<35x64xf32>
    %153 = arith.addf %147, %152 : vector<35x64xf32>
    %154 = vector.extract_strided_slice %103 {offsets = [8, 0], sizes = [1, 64], strides = [1, 1]} : vector<16x64xf32> to vector<1x64xf32>
    %c0_110 = arith.constant 0 : index
    %c8_111 = arith.constant 8 : index
    %c0_112 = arith.constant 0 : index
    %c0_113 = arith.constant 0 : index
    %155 = vector.load %arg3[%c0_110, %c8_111, %c0_112, %c0_113] : memref<1x16x35x64xf32, #tpu.memory_space<vmem>>, vector<1x1x35x64xf32>
    %156 = vector.shape_cast %155 : vector<1x1x35x64xf32> to vector<35x64xf32>
    %157 = vector.broadcast %154 : vector<1x64xf32> to vector<35x64xf32>
    %158 = arith.mulf %157, %156 : vector<35x64xf32>
    %159 = arith.addf %153, %158 : vector<35x64xf32>
    %160 = vector.extract_strided_slice %103 {offsets = [9, 0], sizes = [1, 64], strides = [1, 1]} : vector<16x64xf32> to vector<1x64xf32>
    %c0_114 = arith.constant 0 : index
    %c9_115 = arith.constant 9 : index
    %c0_116 = arith.constant 0 : index
    %c0_117 = arith.constant 0 : index
    %161 = vector.load %arg3[%c0_114, %c9_115, %c0_116, %c0_117] : memref<1x16x35x64xf32, #tpu.memory_space<vmem>>, vector<1x1x35x64xf32>
    %162 = vector.shape_cast %161 : vector<1x1x35x64xf32> to vector<35x64xf32>
    %163 = vector.broadcast %160 : vector<1x64xf32> to vector<35x64xf32>
    %164 = arith.mulf %163, %162 : vector<35x64xf32>
    %165 = arith.addf %159, %164 : vector<35x64xf32>
    %166 = vector.extract_strided_slice %103 {offsets = [10, 0], sizes = [1, 64], strides = [1, 1]} : vector<16x64xf32> to vector<1x64xf32>
    %c0_118 = arith.constant 0 : index
    %c10_119 = arith.constant 10 : index
    %c0_120 = arith.constant 0 : index
    %c0_121 = arith.constant 0 : index
    %167 = vector.load %arg3[%c0_118, %c10_119, %c0_120, %c0_121] : memref<1x16x35x64xf32, #tpu.memory_space<vmem>>, vector<1x1x35x64xf32>
    %168 = vector.shape_cast %167 : vector<1x1x35x64xf32> to vector<35x64xf32>
    %169 = vector.broadcast %166 : vector<1x64xf32> to vector<35x64xf32>
    %170 = arith.mulf %169, %168 : vector<35x64xf32>
    %171 = arith.addf %165, %170 : vector<35x64xf32>
    %172 = vector.extract_strided_slice %103 {offsets = [11, 0], sizes = [1, 64], strides = [1, 1]} : vector<16x64xf32> to vector<1x64xf32>
    %c0_122 = arith.constant 0 : index
    %c11_123 = arith.constant 11 : index
    %c0_124 = arith.constant 0 : index
    %c0_125 = arith.constant 0 : index
    %173 = vector.load %arg3[%c0_122, %c11_123, %c0_124, %c0_125] : memref<1x16x35x64xf32, #tpu.memory_space<vmem>>, vector<1x1x35x64xf32>
    %174 = vector.shape_cast %173 : vector<1x1x35x64xf32> to vector<35x64xf32>
    %175 = vector.broadcast %172 : vector<1x64xf32> to vector<35x64xf32>
    %176 = arith.mulf %175, %174 : vector<35x64xf32>
    %177 = arith.addf %171, %176 : vector<35x64xf32>
    %178 = vector.extract_strided_slice %103 {offsets = [12, 0], sizes = [1, 64], strides = [1, 1]} : vector<16x64xf32> to vector<1x64xf32>
    %c0_126 = arith.constant 0 : index
    %c12_127 = arith.constant 12 : index
    %c0_128 = arith.constant 0 : index
    %c0_129 = arith.constant 0 : index
    %179 = vector.load %arg3[%c0_126, %c12_127, %c0_128, %c0_129] : memref<1x16x35x64xf32, #tpu.memory_space<vmem>>, vector<1x1x35x64xf32>
    %180 = vector.shape_cast %179 : vector<1x1x35x64xf32> to vector<35x64xf32>
    %181 = vector.broadcast %178 : vector<1x64xf32> to vector<35x64xf32>
    %182 = arith.mulf %181, %180 : vector<35x64xf32>
    %183 = arith.addf %177, %182 : vector<35x64xf32>
    %184 = vector.extract_strided_slice %103 {offsets = [13, 0], sizes = [1, 64], strides = [1, 1]} : vector<16x64xf32> to vector<1x64xf32>
    %c0_130 = arith.constant 0 : index
    %c13_131 = arith.constant 13 : index
    %c0_132 = arith.constant 0 : index
    %c0_133 = arith.constant 0 : index
    %185 = vector.load %arg3[%c0_130, %c13_131, %c0_132, %c0_133] : memref<1x16x35x64xf32, #tpu.memory_space<vmem>>, vector<1x1x35x64xf32>
    %186 = vector.shape_cast %185 : vector<1x1x35x64xf32> to vector<35x64xf32>
    %187 = vector.broadcast %184 : vector<1x64xf32> to vector<35x64xf32>
    %188 = arith.mulf %187, %186 : vector<35x64xf32>
    %189 = arith.addf %183, %188 : vector<35x64xf32>
    %190 = vector.extract_strided_slice %103 {offsets = [14, 0], sizes = [1, 64], strides = [1, 1]} : vector<16x64xf32> to vector<1x64xf32>
    %c0_134 = arith.constant 0 : index
    %c14_135 = arith.constant 14 : index
    %c0_136 = arith.constant 0 : index
    %c0_137 = arith.constant 0 : index
    %191 = vector.load %arg3[%c0_134, %c14_135, %c0_136, %c0_137] : memref<1x16x35x64xf32, #tpu.memory_space<vmem>>, vector<1x1x35x64xf32>
    %192 = vector.shape_cast %191 : vector<1x1x35x64xf32> to vector<35x64xf32>
    %193 = vector.broadcast %190 : vector<1x64xf32> to vector<35x64xf32>
    %194 = arith.mulf %193, %192 : vector<35x64xf32>
    %195 = arith.addf %189, %194 : vector<35x64xf32>
    %196 = vector.extract_strided_slice %103 {offsets = [15, 0], sizes = [1, 64], strides = [1, 1]} : vector<16x64xf32> to vector<1x64xf32>
    %c0_138 = arith.constant 0 : index
    %c15_139 = arith.constant 15 : index
    %c0_140 = arith.constant 0 : index
    %c0_141 = arith.constant 0 : index
    %197 = vector.load %arg3[%c0_138, %c15_139, %c0_140, %c0_141] : memref<1x16x35x64xf32, #tpu.memory_space<vmem>>, vector<1x1x35x64xf32>
    %198 = vector.shape_cast %197 : vector<1x1x35x64xf32> to vector<35x64xf32>
    %199 = vector.broadcast %196 : vector<1x64xf32> to vector<35x64xf32>
    %200 = arith.mulf %199, %198 : vector<35x64xf32>
    %201 = arith.addf %195, %200 : vector<35x64xf32>
    %c0_142 = arith.constant 0 : index
    %c0_143 = arith.constant 0 : index
    %c0_144 = arith.constant 0 : index
    %202 = vector.load %arg5[%c0_142, %c0_143, %c0_144] : memref<1x35x64xf32, #tpu.memory_space<vmem>>, vector<1x35x64xf32>
    %203 = vector.shape_cast %202 : vector<1x35x64xf32> to vector<35x64xf32>
    %204 = vector.shape_cast %201 : vector<35x64xf32> to vector<1x35x64xf32>
    tpu.vector_store %arg5[%c0_142, %c0_143, %c0_144], %204 {strides = array<i32>} : memref<1x35x64xf32, #tpu.memory_space<vmem>>, vector<1x35x64xf32>,
    return
  }
  func.func @transform_0(%arg0: i32, %arg1: i32) -> (i32, i32, i32) {
    %c0_i32 = arith.constant 0 : i32
    %c0_i32_0 = arith.constant 0 : i32
    return %arg0, %c0_i32, %arg1 : i32, i32, i32
  }
  func.func @transform_1(%arg0: i32, %arg1: i32) -> (i32, i32, i32, i32) {
    %c0_i32 = arith.constant 0 : i32
    %c0_i32_0 = arith.constant 0 : i32
    %c0_i32_1 = arith.constant 0 : i32
    return %arg0, %c0_i32, %c0_i32_0, %arg1 : i32, i32, i32, i32
  }
  func.func @transform_2(%arg0: i32, %arg1: i32) -> (i32, i32, i32) {
    %c0_i32 = arith.constant 0 : i32
    %c0_i32_0 = arith.constant 0 : i32
    return %arg0, %c0_i32, %arg1 : i32, i32, i32
  }
  func.func @transform_3(%arg0: i32, %arg1: i32) -> (i32, i32, i32) {
    %c0_i32 = arith.constant 0 : i32
    %c0_i32_0 = arith.constant 0 : i32
    return %arg0, %c0_i32, %arg1 : i32, i32, i32
  }
  func.func @transform_4(%arg0: i32, %arg1: i32) -> (i32, i32, i32) {
    %c0_i32 = arith.constant 0 : i32
    %c0_i32_0 = arith.constant 0 : i32
    return %arg0, %c0_i32, %arg1 : i32, i32, i32
  }
}

</mosaic_0001>

<bundles_post_ra>
// kernel: tpu_custom_call.1
= control target key start
LH: loop header
LB: loop body
LE: loop exit
PB: predicated region body
PF: predicated region fallthrough
CT: control target
= control target key end

     0   :  { %10 = vsyncpa [#allocation3], 0  ;;  %s2412_s0 = inlined_call_operand.vmem [shape: f32[2,35,64], index: 0, kind: input, shape index: {}]   ;;  %s2413_s1 = inlined_call_operand.vmem [shape: f32[2,16,35,64], index: 1, kind: input, shape index: {}]   ;;  %s2414_s2 = inlined_call_operand.vmem [shape: f32[2,16,64], index: 2, kind: input, shape index: {}]   ;;  %s2415_s3 = inlined_call_operand.vmem [shape: f32[2,35,64], index: 3, kind: output, shape index: {0}]   ;;  %s2416_s4 = inlined_call_operand.hbm [shape: f32[2,16,64], index: 4, kind: output, shape index: {1}]  }
   0x1   :  { %12 = vsyncpa [#allocation3 + $0x1], 0  ;;  %s1606_s15 = smov 0   ;;  %s1608_s16 = smov 0  }
   0x2   :  { %s1610_s17 = smov 0   ;;  %s1612_s18 = smov 0  }
   0x3   :  { %s1614_s19 = smov 0   ;;  %s1616_s20 = smov 0  }
   0x4 LB: > { %s1267_s21 = sadd.s32 4294967295, %s1576_s20   ;;  %s1268_s22 = sadd.s32 4294967294, %s1576_s20   ;;  %s1576_s20 = sphi %s1616_s20, %s18_s20   ;;  %s1572_s19 = sphi %s1614_s19, %s2543_s19   ;;  %s1568_s18 = sphi %s1612_s18, %s2542_s18   ;;  %s1564_s17 = sphi %s1610_s17, %s2541_s17   ;;  %s1560_s16 = sphi %s1608_s16, %s2540_s16   ;;  %s1556_s15 = sphi %s1606_s15, %s2539_s15  }
   0x5   : > { %s30_s23 = sadd.s32 1, %s1572_s19  ;;  %s151_s24 = sadd.s32 1, %s1564_s17 }
   0x6   : > { %p32_p0 = scmp.ge.s32.totalorder %s30_s23, 2  ;;  %p161_p1 = scmp.ne.s32.totalorder %s1564_s17, %s1560_s16 }
   0x7   : > { %p162_p2 = scmp.eq.s32.totalorder %s1267_s21, 1  ;;  %p167_p3 = scmp.ne.s32.totalorder %s1560_s16, %s1556_s15 }
   0x8   : > { %s2545_s23 = smov (%p32_p0, %s30_s23), 0  ;;  %p168_p5 = scmp.eq.s32.totalorder %s1268_s22, 1 }
   0x9   : > { %p1646_p4 = por %p162_p2, %p161_p1  ;;  %s146_s26 = ssub.s32 %s1572_s19, %s2545_s23 }
   0xa   : > { %p1271_p6 = scmp.ge.s32.totalorder %s1576_s20, 1  ;;  %p149_p7 = scmp.eq.s32.totalorder %s146_s26, 0 }
   0xb   : > { %p1653_p8 = por %p168_p5, %p167_p3  ;;  %p219_p9 = scmp.lt.s32.totalorder %s1576_s20, 3 }
   0xc   : > { %s1659_s28 = scalar_select %p149_p7, %s1564_s17, %s151_s24  }
   0xd   : > { %p220_p10 = pnand %p1271_p6, %p219_p9 }
   0xf   : > { %223 = sbr.rel (%p220_p10) target bundleno = 255 (0xff), region = 32 }
  0x14   : > { %p272_p11 = scmp.lt.s32.totalorder %s1568_s18, 1  ;;  %vm321_vm0 = vcmask 523264   ;;  %vm329_vm1 = vcmask 518144   ;;  %vm728_vm2 = vcmask 1040384   ;;  %vm730_vm3 = vcmask 1041408   ;;  %s269_s22 = sand.u32 1, %s1560_s16  }
  0x15   : > { %vm732_vm4 = vcmask 1042432   ;;  %vm734_vm5 = vcmask 1043456   ;;  %vm736_vm6 = vcmask 1044480   ;;  %vm738_vm7 = vcmask 1045504   ;;  %s1272_s24 = sshll.u32 %s269_s22, 4  ;;  %s1434_s26 = sshll.u32 %s1568_s18, 8 }
  0x16   : > { %s1663_s29 = scalar_select %p272_p11, %s1568_s18, 1  ;;  %vm740_vm8 = vcmask 1046528  }
  0x17   : > { %s2230_s9 = scalar_lea.sflag [#allocation3], %s269_s22 }
  0x18   : > { %s1435_s30 = smul.u32 40, %s1663_s29  ;;  %s1433_s12 = sshll.u32 %s1663_s29, 4 }
  0x19   : > { %s1436_s5 = smul.u32 640, %s1663_s29  ;;  %s295_s21 = scalar_lea.vmem %s2414_s2, %s1433_s12 }
  0x1a   : > { %s279_s8 = scalar_lea.vmem %s2412_s0, %s1435_s30  ;;  %s1578_s12 = smov [#allocation2]  }
  0x1b   : > { %s1675_s11 = scalar_lea.vmem %s2413_s1, %s1436_s5  ;;  %v1677_v0 = vld [vmem:[%s279_s8] sm:$0xff]  ;;  %v1679_v1 = vld [vmem:[%s279_s8 + $0x8] sm:$0xff]  ;;  %v1681_v2 = vld [vmem:[%s279_s8 + $0x10] sm:$0xff]  ;;  %s271_s5 = scalar_lea.vmem [#allocation2], %s1272_s24 }
  0x1c   : > { %v1683_v3 = vld [vmem:[%s279_s8 + $0x18] sm:$0xff]  ;;  %v1685_v4 = vld [vmem:[%s279_s8 + $0x20] sm:$0x7]  ;;  %v1691_v6 = vld [vmem:[%s1675_s11 + $0x8] sm:$0xff]  ;;  %s1117_s6 = sshll.u32 %s271_s5, 4  ;;  %s2191_s8 = scalar_lea.hbm %s2416_s4, %s1434_s26  ;;  %s2193_s6 = int_to_ptr.vmem [resolvable:$true] %s1117_s6 }
  0x1d   : > { %v1688_v5 = vld [vmem:[%s1675_s11] sm:$0xff]  ;;  %v1694_v7 = vld [vmem:[%s1675_s11 + $0x10] sm:$0xff]  ;;  %v1697_v8 = vld [vmem:[%s1675_s11 + $0x18] sm:$0xff]  ;;  %v317_v11 = vmul.f32 %v1691_v6, %v1679_v1  ;;  %s1500_s10 = scalar_lea.vmem %s2193_s6, 256  ;;  %s1504_s13 = sshll.u32 %s1578_s12, 4  ;;  %s1505_s13 = int_to_ptr.vmem [resolvable:$false] %s1504_s13 }
  0x1e   : > { %v316_v9 = vmul.f32 %v1688_v5, %v1677_v0  ;;  %v315_v10 = vld [vmem:[%s1675_s11 + $0x20] sm:$0x7]  ;;  %v318_v12 = vmul.f32 %v1694_v7, %v1681_v2  ;;  %v319_v13 = vmul.f32 %v1697_v8, %v1683_v3  ;;  %v1709_v14 = vld [vmem:[%s1675_s11 + $0x28] sm:$0xff]  ;;  %v1712_v15 = vld [vmem:[%s1675_s11 + $0x30] sm:$0xff]  ;;  %p1501_p12 = scmp.ne.s32.totalorder %s2193_s6, %s1500_s10  ;;  %s1506_s14 = scalar_lea.vmem %s1505_s13, 512 }
  0x1f   : > { %v320_v16 = vmul.f32 %v315_v10, %v1685_v4  ;;  %v1717_v18 = vld [vmem:[%s1675_s11 + $0x38] sm:$0xff]  ;;  %v1720_v19 = vld [vmem:[%s1675_s11 + $0x40] sm:$0xff]  ;;  %v1282_v20 = vld [vmem:[%s1675_s11 + $0x48] sm:$0x7]  ;;  %v344_v21 = vmul.f32 %v1709_v14, %v1677_v0  ;;  %v345_v22 = vmul.f32 %v1712_v15, %v1679_v1  ;;  %v323_v23 = vsel %vm321_vm0, %v317_v11, 0.0  ;;  %p1507_p1 = scmp.lt.s32.totalorder %s2193_s6, %s1505_s13  ;;  %p1508_p2 = scmp.lt.s32.totalorder %s1506_s14, %s1500_s10 }
  0x20   : > { %v322_v17 = vsel %vm321_vm0, %v316_v9, 0.0  ;;  %v325_v24 = vsel %vm321_vm0, %v318_v12, 0.0  ;;  %v327_v25 = vsel %vm321_vm0, %v319_v13, 0.0  ;;  %v346_v26 = vmul.f32 %v1717_v18, %v1681_v2  ;;  %v1733_v27 = vld [vmem:[%s1675_s11 + $0x50] sm:$0xff]  ;;  %v1736_v28 = vld [vmem:[%s1675_s11 + $0x58] sm:$0xff]  ;;  %v1743_v33 = vld [vmem:[%s1675_s11 + $0x60] sm:$0xff]  ;;  %p1502_p13 = pnand %p1501_p12, %p1646_p4 }
  0x21   : > { %v324_v29 = vadd.f32 %v323_v23, %v322_v17  ;;  %v330_v30 = vsel %vm329_vm1, %v320_v16, 0.0  ;;  %v347_v31 = vmul.f32 %v1720_v19, %v1683_v3  ;;  %v348_v32 = vmul.f32 %v1282_v20, %v1685_v4  ;;  %v1746_v34 = vld [vmem:[%s1675_s11 + $0x68] sm:$0xff]  ;;  %v1287_v35 = vld [vmem:[%s1675_s11 + $0x70] sm:$0x7]  ;;  %v1755_v40 = vld [vmem:[%s1675_s11 + $0x78] sm:$0xff]  ;;  %p1509_p3 = por %p1508_p2, %p1507_p1 }
  0x22   : > { %v349_v36 = vsel %vm321_vm0, %v344_v21, 0.0  ;;  %v350_v37 = vsel %vm321_vm0, %v345_v22, 0.0  ;;  %v352_v38 = vsel %vm321_vm0, %v346_v26, 0.0  ;;  %v370_v39 = vmul.f32 %v1733_v27, %v1677_v0  ;;  %v1767_v49 = vld [vmem:[%s1675_s11 + $0x80] sm:$0xff]  ;;  %v1771_v53 = vld [vmem:[%s1675_s11 + $0x88] sm:$0xff]  ;;  %v1774_v54 = vld [vmem:[%s1675_s11 + $0x90] sm:$0xff]  ;;  %p1503_p0 = pneg %p1502_p13 }
  0x23   : > { %v326_v41 = vadd.f32 %v325_v24, %v324_v29  ;;  %v351_v42 = vadd.f32 %v350_v37, %v349_v36  ;;  %v354_v43 = vsel %vm321_vm0, %v347_v31, 0.0  ;;  %v356_v44 = vsel %vm329_vm1, %v348_v32, 0.0  ;;  %v1292_v55 = vld [vmem:[%s1675_s11 + $0x98] sm:$0x7]  ;;  %v1792_v16 = vld [vmem:[%s1675_s11 + $0xa0] sm:$0xff]  ;;  %v1796_v23 = vld [vmem:[%s1675_s11 + $0xa8] sm:$0xff] }
  0x24   : > { %v371_v45 = vmul.f32 %v1736_v28, %v1679_v1  ;;  %v372_v46 = vmul.f32 %v1743_v33, %v1681_v2  ;;  %v373_v47 = vmul.f32 %v1746_v34, %v1683_v3  ;;  %v374_v48 = vmul.f32 %v1287_v35, %v1685_v4  ;;  %v1799_v24 = vld [vmem:[%s1675_s11 + $0xb0] sm:$0xff]  ;;  %v1297_v32 = vld [vmem:[%s1675_s11 + $0xc0] sm:$0x7]  ;;  %p1510_p5 = pnand %p1509_p3, %p1503_p0 }
  0x25   : > { %v328_v50 = vadd.f32 %v327_v25, %v326_v41  ;;  %v353_v51 = vadd.f32 %v352_v38, %v351_v42  ;;  %v375_v52 = vsel %vm321_vm0, %v370_v39, 0.0  ;;  %v396_v56 = vmul.f32 %v1755_v40, %v1677_v0  ;;  %v1802_v25 = vld [vmem:[%s1675_s11 + $0xb8] sm:$0xff] }
  0x26   : > { %v376_v57 = vsel %vm321_vm0, %v371_v45, 0.0  ;;  %v378_v58 = vsel %vm321_vm0, %v372_v46, 0.0  ;;  %v380_v59 = vsel %vm321_vm0, %v373_v47, 0.0  ;;  %v382_v60 = vsel %vm329_vm1, %v374_v48, 0.0  ;;  %v1818_v48 = vld [vmem:[%s1675_s11 + $0xc8] sm:$0xff] }
  0x27   : > { %v331_v61 = vadd.f32 %v330_v30, %v328_v50  ;;  %v355_v62 = vadd.f32 %v354_v43, %v353_v51  ;;  %v377_v63 = vadd.f32 %v376_v57, %v375_v52  ;;  %v397_v9 = vmul.f32 %v1767_v49, %v1679_v1 }
  0x28   : > { %v398_v10 = vmul.f32 %v1771_v53, %v1681_v2  ;;  %v399_v11 = vmul.f32 %v1774_v54, %v1683_v3  ;;  %v400_v12 = vmul.f32 %v1292_v55, %v1685_v4  ;;  %v401_v13 = vsel %vm321_vm0, %v396_v56, 0.0 }
  0x29   : > { %v332_v17 = vrot.slane %v331_v61, 4  ;;  %v357_v20 = vadd.f32 %v356_v44, %v355_v62  ;;  %v379_v21 = vadd.f32 %v378_v58, %v377_v63  ;;  %v402_v22 = vsel %vm321_vm0, %v397_v9, 0.0 }
  0x2a   : > { %v403_v26 = vadd.f32 %v402_v22, %v401_v13  ;;  %v404_v29 = vsel %vm321_vm0, %v398_v10, 0.0  ;;  %v406_v30 = vsel %vm321_vm0, %v399_v11, 0.0  ;;  %v408_v31 = vsel %vm329_vm1, %v400_v12, 0.0 }
  0x2b   : > { %v333_v35 = vadd.f32 %v332_v17, %v331_v61  ;;  %v358_v36 = vrot.slane %v357_v20, 4  ;;  %v381_v37 = vadd.f32 %v380_v59, %v379_v21  ;;  %v422_v38 = vmul.f32 %v1792_v16, %v1677_v0  ;;  %v1824_v59 = vld [vmem:[%s1675_s11 + $0xd0] sm:$0xff]  ;;  %v1827_v61 = vld [vmem:[%s1675_s11 + $0xd8] sm:$0xff] }
  0x2c   : > { %v405_v39 = vadd.f32 %v404_v29, %v403_v26  ;;  %v423_v41 = vmul.f32 %v1796_v23, %v1679_v1  ;;  %v424_v42 = vmul.f32 %v1799_v24, %v1681_v2  ;;  %v425_v43 = vmul.f32 %v1802_v25, %v1683_v3 }
  0x2d   : > { %v334_v44 = vrot.slane %v333_v35, 2  ;;  %v359_v45 = vadd.f32 %v358_v36, %v357_v20  ;;  %v383_v46 = vadd.f32 %v382_v60, %v381_v37  ;;  %v426_v47 = vmul.f32 %v1297_v32, %v1685_v4  ;;  %v1830_v60 = vld [vmem:[%s1675_s11 + $0xe0] sm:$0xff]  ;;  %v1302_v20 = vld [vmem:[%s1675_s11 + $0xe8] sm:$0x7]  ;;  %v1847_v37 = vld [vmem:[%s1675_s11 + $0xf0] sm:$0xff] }
  0x2e   : > { %v407_v50 = vadd.f32 %v406_v30, %v405_v39  ;;  %v427_v51 = vsel %vm321_vm0, %v422_v38, 0.0  ;;  %v428_v52 = vsel %vm321_vm0, %v423_v41, 0.0  ;;  %v430_v55 = vsel %vm321_vm0, %v424_v42, 0.0  ;;  %2459 = vst [vmem:[#allocation5_spill] sm:$0xff] %v1830_v60  ;;  %2460 = vst [vmem:[#allocation6_spill] sm:$0xff] %v1847_v37  ;;  %v1850_v42 = vld [vmem:[%s1675_s11 + $0xf8] sm:$0xff] }
  0x2f   : > { %v360_v56 = vrot.slane %v359_v45, 2  ;;  %v384_v57 = vrot.slane %v383_v46, 4  ;;  %v429_v58 = vadd.f32 %v428_v52, %v427_v51  ;;  %v335_v62 = vadd.f32 %v334_v44, %v333_v35  ;;  %2461 = vst [vmem:[#allocation7_spill] sm:$0xff] %v1850_v42  ;;  %v1856_v44 = vld [vmem:[%s1675_s11 + $0x108] sm:$0xff]  ;;  %v1307_v51 = vld [vmem:[%s1675_s11 + $0x110] sm:$0x7] }
  0x30   : > { %v409_v63 = vadd.f32 %v408_v31, %v407_v50  ;;  %v432_v9 = vsel %vm321_vm0, %v425_v43, 0.0  ;;  %v448_v10 = vmul.f32 %v1818_v48, %v1677_v0  ;;  %v434_v17 = vsel %vm329_vm1, %v426_v47, 0.0  ;;  %v1853_v43 = vld [vmem:[%s1675_s11 + $0x100] sm:$0xff]  ;;  %2463 = vst [vmem:[#allocation9_spill] sm:$0xff] %v1856_v44 }
  0x31   : > { %v361_v11 = vadd.f32 %v360_v56, %v359_v45  ;;  %v385_v12 = vadd.f32 %v384_v57, %v383_v46  ;;  %v431_v13 = vadd.f32 %v430_v55, %v429_v58  ;;  %v449_v22 = vmul.f32 %v1824_v59, %v1679_v1  ;;  %2462 = vst [vmem:[#allocation8_spill] sm:$0xff] %v1853_v43 }
  0x32   : > { %v410_v21 = vrot.slane %v409_v63, 4  ;;  %v450_v26 = vmul.f32 %v1827_v61, %v1681_v2  ;;  %v451_v29 = vmul.f32 %v1830_v60, %v1683_v3  ;;  %v452_v32 = vmul.f32 %v1302_v20, %v1685_v4  ;;  %v1874_v20 = vld [vmem:[%s1675_s11 + $0x118] sm:$0xff] }
  0x33   : > { %v386_v30 = vrot.slane %v385_v12, 2  ;;  %v433_v31 = vadd.f32 %v432_v9, %v431_v13  ;;  %v453_v35 = vsel %vm321_vm0, %v448_v10, 0.0  ;;  %v454_v36 = vsel %vm321_vm0, %v449_v22, 0.0  ;;  %2464 = vst [vmem:[#allocation10_spill] sm:$0xff] %v1874_v20 }
  0x34   : > { %v336_v38 = vrot.slane %v335_v62, 1  ;;  %v455_v41 = vadd.f32 %v454_v36, %v453_v35  ;;  %v362_v45 = vrot.slane %v361_v11, 1  ;;  %v411_v46 = vadd.f32 %v410_v21, %v409_v63  ;;  %v1877_v21 = vld [vmem:[%s1675_s11 + $0x120] sm:$0xff] }
  0x35   : > { %v435_v39 = vadd.f32 %v434_v17, %v433_v31  ;;  %v456_v47 = vsel %vm321_vm0, %v450_v26, 0.0  ;;  %v458_v50 = vsel %vm321_vm0, %v451_v29, 0.0  ;;  %v387_v52 = vadd.f32 %v386_v30, %v385_v12  ;;  %2465 = vst [vmem:[#allocation11_spill] sm:$0xff] %v1877_v21  ;;  %v1885_v31 = vld [vmem:[%s1675_s11 + $0x128] sm:$0xff] }
  0x36   : > { %v457_v56 = vadd.f32 %v456_v47, %v455_v41  ;;  %v474_v57 = vmul.f32 %v1847_v37, %v1677_v0  ;;  %v460_v58 = vsel %vm329_vm1, %v452_v32, 0.0  ;;  %v475_v9 = vmul.f32 %v1850_v42, %v1679_v1  ;;  %2466 = vst [vmem:[#allocation12_spill] sm:$0xff] %v1885_v31  ;;  %v1312_v41 = vld [vmem:[%s1675_s11 + $0x138] sm:$0x7] }
  0x37   : > { %v436_v55 = vrot.slane %v435_v39, 4  ;;  %v476_v63 = vmul.f32 %v1853_v43, %v1681_v2  ;;  %v477_v10 = vmul.f32 %v1856_v44, %v1683_v3  ;;  %v1870_v12 = vadd.f32 %v336_v38, %v335_v62  ;;  %v1888_v38 = vld [vmem:[%s1675_s11 + $0x130] sm:$0xff] }
  0x38   : > { %v459_v13 = vadd.f32 %v458_v50, %v457_v56  ;;  %v478_v17 = vmul.f32 %v1307_v51, %v1685_v4  ;;  %v1879_v22 = vadd.f32 %v362_v45, %v361_v11  ;;  %v479_v26 = vsel %vm321_vm0, %v474_v57, 0.0  ;;  %2467 = vst [vmem:[#allocation13_spill] sm:$0xff] %v1888_v38  ;;  %v1900_v57 = vld [vmem:[%s1675_s11 + $0x140] sm:$0xff] }
  0x39   : > { %v480_v29 = vsel %vm321_vm0, %v475_v9, 0.0  ;;  %v482_v30 = vsel %vm321_vm0, %v476_v63, 0.0  ;;  %v412_v62 = vrot.slane %v411_v46, 2  ;;  %v437_v32 = vadd.f32 %v436_v55, %v435_v39  ;;  %2468 = vst [vmem:[#allocation14_spill] sm:$0xff] %v1900_v57 }
  0x3a   : > { %v461_v35 = vadd.f32 %v460_v58, %v459_v13  ;;  %v481_v36 = vadd.f32 %v480_v29, %v479_v26  ;;  %v388_v47 = vrot.slane %v387_v52, 1  ;;  %v484_v11 = vsel %vm321_vm0, %v477_v10, 0.0 }
  0x3b   : > { %v500_v45 = vmul.f32 %v1874_v20, %v1677_v0  ;;  %v501_v50 = vmul.f32 %v1877_v21, %v1679_v1  ;;  %v486_v39 = vsel %vm329_vm1, %v478_v17, 0.0  ;;  %v502_v55 = vmul.f32 %v1885_v31, %v1681_v2  ;;  %v1908_v17 = vld [vmem:[%s1675_s11 + $0x148] sm:$0xff]  ;;  %v1914_v31 = vld [vmem:[%s1675_s11 + $0x158] sm:$0xff] }
  0x3c   : > { %v462_v51 = vrot.slane %v461_v35, 4  ;;  %v483_v56 = vadd.f32 %v482_v30, %v481_v36  ;;  %v503_v58 = vmul.f32 %v1888_v38, %v1683_v3  ;;  %v504_v9 = vmul.f32 %v1312_v41, %v1685_v4  ;;  %2469 = vst [vmem:[#allocation15_spill] sm:$0xff] %v1908_v17  ;;  %v1911_v36 = vld [vmem:[%s1675_s11 + $0x150] sm:$0xff]  ;;  %2471 = vst [vmem:[#allocation17_spill] sm:$0xff] %v1914_v31 }
  0x3d   : > { %v505_v63 = vsel %vm321_vm0, %v500_v45, 0.0  ;;  %v506_v10 = vsel %vm321_vm0, %v501_v50, 0.0  ;;  %v438_v13 = vrot.slane %v437_v32, 2  ;;  %2470 = vst [vmem:[#allocation16_spill] sm:$0xff] %v1911_v36  ;;  %v413_v21 = vadd.f32 %v412_v62, %v411_v46  ;;  %v1317_v45 = vld [vmem:[%s1675_s11 + $0x160] sm:$0x7] }
  0x3e   : > { %v463_v26 = vadd.f32 %v462_v51, %v461_v35  ;;  %v485_v29 = vadd.f32 %v484_v11, %v483_v56  ;;  %v507_v30 = vadd.f32 %v506_v10, %v505_v63  ;;  %v508_v38 = vsel %vm321_vm0, %v502_v55, 0.0 }
  0x3f   : > { %v510_v41 = vsel %vm321_vm0, %v503_v58, 0.0  ;;  %v526_v35 = vmul.f32 %v1900_v57, %v1677_v0  ;;  %v1921_v11 = vadd.f32 %v388_v47, %v387_v52  ;;  %v512_v63 = vsel %vm329_vm1, %v504_v9, 0.0  ;;  %v1931_v58 = vld [vmem:[%s1675_s11 + $0x168] sm:$0xff]  ;;  %v1939_v9 = vld [vmem:[%s1675_s11 + $0x178] sm:$0xff] }
  0x40   : > { %v464_v50 = vrot.slane %v463_v26, 2  ;;  %v487_v51 = vadd.f32 %v486_v39, %v485_v29  ;;  %v509_v56 = vadd.f32 %v508_v38, %v507_v30  ;;  %v527_v46 = vmul.f32 %v1908_v17, %v1679_v1  ;;  %2472 = vst [vmem:[#allocation18_spill] sm:$0xff] %v1931_v58  ;;  %v1936_v39 = vld [vmem:[%s1675_s11 + $0x170] sm:$0xff]  ;;  %2474 = vst [vmem:[#allocation20_spill] sm:$0xff] %v1939_v9  ;;  %v1942_v29 = vld [vmem:[%s1675_s11 + $0x180] sm:$0xff] }
  0x41   : > { %v528_v62 = vmul.f32 %v1911_v36, %v1681_v2  ;;  %v529_v55 = vmul.f32 %v1914_v31, %v1683_v3  ;;  %v439_v10 = vadd.f32 %v438_v13, %v437_v32  ;;  %v530_v47 = vmul.f32 %v1317_v45, %v1685_v4  ;;  %2473 = vst [vmem:[#allocation19_spill] sm:$0xff] %v1936_v39 }
  0x42   : > { %v511_v52 = vadd.f32 %v510_v41, %v509_v56  ;;  %v531_v38 = vsel %vm321_vm0, %v526_v35, 0.0  ;;  %2475 = vst [vmem:[#allocation21_spill] sm:$0xff] %v1942_v29  ;;  %v414_v30 = vrot.slane %v413_v21, 1  ;;  %v465_v36 = vadd.f32 %v464_v50, %v463_v26  ;;  %v1322_v35 = vld [vmem:[%s1675_s11 + $0x188] sm:$0x7] }
  0x43   : > { %v532_v31 = vsel %vm321_vm0, %v527_v46, 0.0  ;;  %v534_v17 = vsel %vm321_vm0, %v528_v62, 0.0  ;;  %v488_v32 = vrot.slane %v487_v51, 4  ;;  %v536_v45 = vsel %vm321_vm0, %v529_v55, 0.0  ;;  %v1958_v55 = vld [vmem:[%s1675_s11 + $0x190] sm:$0xff] }
  0x44   : > { %v513_v13 = vadd.f32 %v512_v63, %v511_v52  ;;  %v533_v41 = vadd.f32 %v532_v31, %v531_v38  ;;  %v552_v56 = vmul.f32 %v1931_v58, %v1677_v0  ;;  %v553_v57 = vmul.f32 %v1936_v39, %v1679_v1  ;;  %2476 = vst [vmem:[#allocation22_spill] sm:$0xff] %v1958_v55  ;;  %v1961_v52 = vld [vmem:[%s1675_s11 + $0x198] sm:$0xff] }
  0x45   : > { %v554_v26 = vmul.f32 %v1939_v9, %v1681_v2  ;;  %v555_v50 = vmul.f32 %v1942_v29, %v1683_v3  ;;  %v440_v46 = vrot.slane %v439_v10, 1  ;;  %v538_v62 = vsel %vm329_vm1, %v530_v47, 0.0  ;;  %2477 = vst [vmem:[#allocation23_spill] sm:$0xff] %v1961_v52  ;;  %v1971_v47 = vld [vmem:[%s1675_s11 + $0x1a8] sm:$0xff] }
  0x46   : > { %v514_v63 = vrot.slane %v513_v13, 4  ;;  %v535_v31 = vadd.f32 %v534_v17, %v533_v41  ;;  %v556_v38 = vmul.f32 %v1322_v35, %v1685_v4  ;;  %v557_v39 = vsel %vm321_vm0, %v552_v56, 0.0  ;;  %v1968_v17 = vld [vmem:[%s1675_s11 + $0x1a0] sm:$0xff]  ;;  %2479 = vst [vmem:[#allocation25_spill] sm:$0xff] %v1971_v47  ;;  %v1327_v35 = vld [vmem:[%s1675_s11 + $0x1b0] sm:$0x7] }
  0x47   : > { %v558_v9 = vsel %vm321_vm0, %v553_v57, 0.0  ;;  %v560_v58 = vsel %vm321_vm0, %v554_v26, 0.0  ;;  %v466_v29 = vrot.slane %v465_v36, 1  ;;  %v489_v20 = vadd.f32 %v488_v32, %v487_v51  ;;  %2478 = vst [vmem:[#allocation24_spill] sm:$0xff] %v1968_v17 }
  0x48   : > { %v537_v44 = vadd.f32 %v536_v45, %v535_v31  ;;  %v559_v43 = vadd.f32 %v558_v9, %v557_v39  ;;  %v1973_v41 = vadd.f32 %v514_v63, %v513_v13  ;;  %v562_v42 = vsel %vm321_vm0, %v555_v50, 0.0  ;;  %v1992_v63 = vld [vmem:[%s1675_s11 + $0x1b8] sm:$0xff] }
  0x49   : > { %v578_v57 = vmul.f32 %v1958_v55, %v1677_v0  ;;  %v579_v51 = vmul.f32 %v1961_v52, %v1679_v1  ;;  %v1981_v39 = vadd.f32 %v414_v30, %v413_v21  ;;  %v1983_v9 = vadd.f32 %v440_v46, %v439_v10  ;;  %2480 = vst [vmem:[#allocation26_spill] sm:$0xff] %v1992_v63  ;;  %v2004_v30 = vld [vmem:[%s1675_s11 + $0x1d0] sm:$0xff] }
  0x4a   : > { %v539_v32 = vadd.f32 %v538_v62, %v537_v44  ;;  %v561_v45 = vadd.f32 %v560_v58, %v559_v43  ;;  %v564_v13 = vsel %vm329_vm1, %v556_v38, 0.0  ;;  %v580_v56 = vmul.f32 %v1968_v17, %v1681_v2  ;;  %v1998_v43 = vld [vmem:[%s1675_s11 + $0x1c0] sm:$0xff]  ;;  %v2001_v58 = vld [vmem:[%s1675_s11 + $0x1c8] sm:$0xff]  ;;  %2483 = vst [vmem:[#allocation29_spill] sm:$0xff] %v2004_v30 }
  0x4b   : > { %v581_v26 = vmul.f32 %v1971_v47, %v1683_v3  ;;  %v583_v50 = vsel %vm321_vm0, %v578_v57, 0.0  ;;  %v1994_v31 = vadd.f32 %v466_v29, %v465_v36  ;;  %v582_v44 = vmul.f32 %v1327_v35, %v1685_v4  ;;  %2481 = vst [vmem:[#allocation27_spill] sm:$0xff] %v1998_v43  ;;  %2482 = vst [vmem:[#allocation28_spill] sm:$0xff] %v2001_v58 }
  0x4c   : > { %v540_v21 = vrot.slane %v539_v32, 4  ;;  %v563_v10 = vadd.f32 %v562_v42, %v561_v45  ;;  %v490_v46 = vrot.slane %v489_v20, 2  ;;  %v516_v62 = vrot.slane %v1973_v41, 2  ;;  %v1332_v45 = vld [vmem:[%s1675_s11 + $0x1d8] sm:$0x7] }
  0x4d   : > { %v584_v38 = vsel %vm321_vm0, %v579_v51, 0.0  ;;  %v586_v36 = vsel %vm321_vm0, %v580_v56, 0.0  ;;  %v588_v35 = vsel %vm321_vm0, %v581_v26, 0.0  ;;  %v604_v47 = vmul.f32 %v1992_v63, %v1677_v0 }
  0x4e   : > { %v541_v29 = vadd.f32 %v540_v21, %v539_v32  ;;  %v565_v57 = vadd.f32 %v564_v13, %v563_v10  ;;  %v585_v42 = vadd.f32 %v584_v38, %v583_v50  ;;  %v605_v17 = vmul.f32 %v1998_v43, %v1679_v1  ;;  %v2021_v50 = vld [vmem:[%s1675_s11 + $0x1e0] sm:$0xff]  ;;  %v2024_v21 = vld [vmem:[%s1675_s11 + $0x1e8] sm:$0xff] }
  0x4f   : > { %v606_v52 = vmul.f32 %v2001_v58, %v1681_v2  ;;  %v607_v51 = vmul.f32 %v2004_v30, %v1683_v3  ;;  %v590_v26 = vsel %vm329_vm1, %v582_v44, 0.0  ;;  %2484 = vst [vmem:[#allocation30_spill] sm:$0xff] %v2021_v50  ;;  %2485 = vst [vmem:[#allocation31_spill] sm:$0xff] %v2024_v21  ;;  %v608_v10 = vmul.f32 %v1332_v45, %v1685_v4  ;;  %v2034_v44 = vld [vmem:[%s1675_s11 + $0x1f8] sm:$0xff]  ;;  %v1337_v45 = vld [vmem:[%s1675_s11 + $0x200] sm:$0x7] }
  0x50   : > { %v542_v32 = vrot.slane %v541_v29, 2  ;;  %v566_v13 = vrot.slane %v565_v57, 4  ;;  %v587_v56 = vadd.f32 %v586_v36, %v585_v42  ;;  %v609_v38 = vsel %vm321_vm0, %v604_v47, 0.0  ;;  %v2031_v36 = vld [vmem:[%s1675_s11 + $0x1f0] sm:$0xff]  ;;  %2487 = vst [vmem:[#allocation33_spill] sm:$0xff] %v2034_v44 }
  0x51   : > { %v610_v58 = vsel %vm321_vm0, %v605_v17, 0.0  ;;  %v612_v43 = vsel %vm321_vm0, %v606_v52, 0.0  ;;  %2486 = vst [vmem:[#allocation32_spill] sm:$0xff] %v2031_v36  ;;  %v2036_v42 = vadd.f32 %v490_v46, %v489_v20  ;;  %v614_v60 = vsel %vm321_vm0, %v607_v51, 0.0 }
  0x52   : > { %v543_v30 = vadd.f32 %v542_v32, %v541_v29  ;;  %v567_v63 = vadd.f32 %v566_v13, %v565_v57  ;;  %v589_v55 = vadd.f32 %v588_v35, %v587_v56  ;;  %v611_v37 = vadd.f32 %v610_v58, %v609_v38  ;;  %v2051_v32 = vld [vmem:[%s1675_s11 + $0x208] sm:$0xff] }
  0x53   : > { %v630_v17 = vmul.f32 %v2021_v50, %v1677_v0  ;;  %v631_v52 = vmul.f32 %v2024_v21, %v1679_v1  ;;  %v616_v35 = vsel %vm329_vm1, %v608_v10, 0.0  ;;  %v632_v20 = vmul.f32 %v2031_v36, %v1681_v2  ;;  %2488 = vst [vmem:[#allocation34_spill] sm:$0xff] %v2051_v32  ;;  %v2092_v50 = vld [vmem:[%s1675_s11 + $0x240] sm:$0xff] }
  0x54   : > { %v544_v47 = vrot.slane %v543_v30, 1  ;;  %v568_v58 = vrot.slane %v567_v63, 2  ;;  %v591_v29 = vadd.f32 %v590_v26, %v589_v55  ;;  %v613_v57 = vadd.f32 %v612_v43, %v611_v37  ;;  %v2058_v55 = vld [vmem:[%s1675_s11 + $0x210] sm:$0xff]  ;;  %v2061_v43 = vld [vmem:[%s1675_s11 + $0x218] sm:$0xff]  ;;  %v2064_v26 = vld [vmem:[%s1675_s11 + $0x220] sm:$0xff]  ;;  %2494 = vst [vmem:[#allocation40_spill] sm:$0xff] %v2092_v50 }
  0x55   : > { %v633_v46 = vmul.f32 %v2034_v44, %v1683_v3  ;;  %v635_v51 = vsel %vm321_vm0, %v630_v17, 0.0  ;;  %v2054_v13 = vadd.f32 %v516_v62, %v1973_v41  ;;  %v634_v37 = vmul.f32 %v1337_v45, %v1685_v4  ;;  %2489 = vst [vmem:[#allocation35_spill] sm:$0xff] %v2058_v55  ;;  %2490 = vst [vmem:[#allocation36_spill] sm:$0xff] %v2061_v43 }
  0x56   : > { %v592_v56 = vrot.slane %v591_v29, 4  ;;  %v615_v38 = vadd.f32 %v614_v60, %v613_v57  ;;  %2491 = vst [vmem:[#allocation37_spill] sm:$0xff] %v2064_v26  ;;  %v2066_v10 = vadd.f32 %v544_v47, %v543_v30  ;;  %v569_v44 = vadd.f32 %v568_v58, %v567_v63  ;;  %v1342_v57 = vld [vmem:[%s1675_s11 + $0x228] sm:$0x7] }
  0x57   : > { %v636_v17 = vsel %vm321_vm0, %v631_v52, 0.0  ;;  %v638_v41 = vsel %vm321_vm0, %v632_v20, 0.0  ;;  %v640_v45 = vsel %vm321_vm0, %v633_v46, 0.0  ;;  %v656_v21 = vmul.f32 %v2051_v32, %v1677_v0  ;;  %v2082_v20 = vld [vmem:[%s1675_s11 + $0x230] sm:$0xff]  ;;  %v2085_v46 = vld [vmem:[%s1675_s11 + $0x238] sm:$0xff] }
  0x58   : > { %v593_v62 = vadd.f32 %v592_v56, %v591_v29  ;;  %v617_v36 = vadd.f32 %v616_v35, %v615_v38  ;;  %v637_v60 = vadd.f32 %v636_v17, %v635_v51  ;;  %v657_v30 = vmul.f32 %v2058_v55, %v1679_v1  ;;  %2492 = vst [vmem:[#allocation38_spill] sm:$0xff] %v2082_v20 }
  0x59   : > { %v658_v63 = vmul.f32 %v2061_v43, %v1681_v2  ;;  %v659_v52 = vmul.f32 %v2064_v26, %v1683_v3  ;;  %v642_v35 = vsel %vm329_vm1, %v634_v37, 0.0  ;;  %2493 = vst [vmem:[#allocation39_spill] sm:$0xff] %v2085_v46  ;;  %v660_v51 = vmul.f32 %v1342_v57, %v1685_v4  ;;  %v1347_v37 = vld [vmem:[%s1675_s11 + $0x250] sm:$0x7] }
  0x5a   : > { %v594_v47 = vrot.slane %v593_v62, 2  ;;  %v618_v58 = vrot.slane %v617_v36, 4  ;;  %v639_v29 = vadd.f32 %v638_v41, %v637_v60  ;;  %v661_v56 = vsel %vm321_vm0, %v656_v21, 0.0  ;;  %v2095_v41 = vld [vmem:[%s1675_s11 + $0x248] sm:$0xff] }
  0x5b   : > { %v662_v38 = vsel %vm321_vm0, %v657_v30, 0.0  ;;  %v664_v17 = vsel %vm321_vm0, %v658_v63, 0.0  ;;  %v570_v26 = vrot.slane %v569_v44, 1  ;;  %2495 = vst [vmem:[#allocation41_spill] sm:$0xff] %v2095_v41  ;;  %v666_v57 = vsel %vm321_vm0, %v659_v52, 0.0 }
  0x5c   : > { %v619_v43 = vadd.f32 %v618_v58, %v617_v36  ;;  %v641_v55 = vadd.f32 %v640_v45, %v639_v29  ;;  %v663_v32 = vadd.f32 %v662_v38, %v661_v56  ;;  %v595_v60 = vadd.f32 %v594_v47, %v593_v62  ;;  %v2111_v56 = vld [vmem:[%s1675_s11 + $0x258] sm:$0xff] }
  0x5d   : > { %v682_v21 = vmul.f32 %v2082_v20, %v1677_v0  ;;  %v683_v30 = vmul.f32 %v2085_v46, %v1679_v1  ;;  %v668_v58 = vsel %vm329_vm1, %v660_v51, 0.0  ;;  %v684_v62 = vmul.f32 %v2092_v50, %v1681_v2  ;;  %2496 = vst [vmem:[#allocation42_spill] sm:$0xff] %v2111_v56  ;;  %v2117_v51 = vld [vmem:[%s1675_s11 + $0x268] sm:$0xff] }
  0x5e   : > { %v620_v36 = vrot.slane %v619_v43, 2  ;;  %v643_v45 = vadd.f32 %v642_v35, %v641_v55  ;;  %v665_v63 = vadd.f32 %v664_v17, %v663_v32  ;;  %v685_v52 = vmul.f32 %v2095_v41, %v1683_v3  ;;  %v2114_v35 = vld [vmem:[%s1675_s11 + $0x260] sm:$0xff]  ;;  %2498 = vst [vmem:[#allocation44_spill] sm:$0xff] %v2117_v51  ;;  %v2120_v17 = vld [vmem:[%s1675_s11 + $0x270] sm:$0xff] }
  0x5f   : > { %v686_v47 = vmul.f32 %v1347_v37, %v1685_v4  ;;  %v687_v29 = vsel %vm321_vm0, %v682_v21, 0.0  ;;  %v571_v38 = vadd.f32 %v570_v26, %v569_v44  ;;  %2497 = vst [vmem:[#allocation43_spill] sm:$0xff] %v2114_v35  ;;  %v596_v50 = vrot.slane %v595_v60, 1 }
  0x60   : > { %v621_v46 = vadd.f32 %v620_v36, %v619_v43  ;;  %v644_v55 = vrot.slane %v643_v45, 4  ;;  %v667_v32 = vadd.f32 %v666_v57, %v665_v63  ;;  %v688_v41 = vsel %vm321_vm0, %v683_v30, 0.0  ;;  %v1352_v36 = vld [vmem:[%s1675_s11 + $0x278] sm:$0x7] }
  0x61   : > { %v690_v37 = vsel %vm321_vm0, %v684_v62, 0.0  ;;  %v692_v21 = vsel %vm321_vm0, %v685_v52, 0.0  ;;  %v689_v26 = vadd.f32 %v688_v41, %v687_v29  ;;  %v694_v57 = vsel %vm329_vm1, %v686_v47, 0.0 }
  0x62   : > { %v645_v44 = vadd.f32 %v644_v55, %v643_v45  ;;  %v669_v43 = vadd.f32 %v668_v58, %v667_v32  ;;  %v708_v63 = vmul.f32 %v2111_v56, %v1677_v0  ;;  %v709_v20 = vmul.f32 %v2114_v35, %v1679_v1 }
  0x63   : > { %v710_v30 = vmul.f32 %v2117_v51, %v1681_v2  ;;  %v711_v62 = vmul.f32 %v2120_v17, %v1683_v3  ;;  %v622_v52 = vrot.slane %v621_v46, 1  ;;  %v691_v41 = vadd.f32 %v690_v37, %v689_v26 }
  0x64   : > { %v646_v45 = vrot.slane %v645_v44, 2  ;;  %v670_v58 = vrot.slane %v669_v43, 4  ;;  %v712_v47 = vmul.f32 %v1352_v36, %v1685_v4  ;;  %v713_v29 = vsel %vm321_vm0, %v708_v63, 0.0 }
  0x65   : > { %v714_v55 = vsel %vm321_vm0, %v709_v20, 0.0  ;;  %v716_v0 = vsel %vm321_vm0, %v710_v30, 0.0  ;;  %v693_v35 = vadd.f32 %v692_v21, %v691_v41  ;;  %v492_v2 = vrot.slane %v2036_v42, 1 }
  0x66   : > { %v647_v32 = vadd.f32 %v646_v45, %v645_v44  ;;  %v671_v1 = vadd.f32 %v670_v58, %v669_v43  ;;  %v715_v56 = vadd.f32 %v714_v55, %v713_v29  ;;  %v597_v51 = vadd.f32 %v596_v50, %v595_v60  ;;  %v309_v55 = vld [vmem:[%s295_s21] sm:$0xff] }
  0x67   : > { %v718_v3 = vsel %vm321_vm0, %v711_v62, 0.0  ;;  %v729_v37 = vsel %vm728_vm2, %v1870_v12, %v1879_v22  ;;  %v695_v26 = vadd.f32 %v694_v57, %v693_v35  ;;  %v742_v20 = vsel %vm728_vm2, %v2066_v10, %v571_v38 }
  0x68   : > { %v672_v4 = vrot.slane %v671_v1, 2  ;;  %v717_v36 = vadd.f32 %v716_v0, %v715_v56  ;;  %v518_v44 = vrot.slane %v2054_v13, 1  ;;  %v648_v21 = vrot.slane %v647_v32, 1 }
  0x69   : > { %v720_v43 = vsel %vm329_vm1, %v712_v47, 0.0  ;;  %v731_v50 = vsel %vm730_vm3, %v729_v37, %v1921_v11  ;;  %v623_v60 = vadd.f32 %v622_v52, %v621_v46  ;;  %v696_v30 = vrot.slane %v695_v26, 4  ;;  %v310_v37 = vld [vmem:[%s295_s21 + $0x8] sm:$0xff] }
  0x6a   : > { %v673_v63 = vadd.f32 %v672_v4, %v671_v1  ;;  %v719_v62 = vadd.f32 %v718_v3, %v717_v36  ;;  %v493_v12 = vadd.f32 %v492_v2, %v2036_v42  ;;  %v733_v22 = vsel %vm732_vm4, %v731_v50, %v1981_v39 }
  0x6b   : > { %v743_v10 = vsel %vm730_vm3, %v742_v20, %v597_v51  ;;  %v697_v38 = vadd.f32 %v696_v30, %v695_v26  ;;  %v735_v57 = vsel %vm734_vm5, %v733_v22, %v1983_v9  ;;  %v649_v11 = vadd.f32 %v648_v21, %v647_v32 }
  0x6c   : > { %v674_v56 = vrot.slane %v673_v63, 1  ;;  %v721_v35 = vadd.f32 %v720_v43, %v719_v62  ;;  %v737_v46 = vsel %vm736_vm6, %v735_v57, %v1994_v31  ;;  %v519_v52 = vadd.f32 %v518_v44, %v2054_v13 }
  0x6d   : > { %v698_v42 = vrot.slane %v697_v38, 2  ;;  %v744_v39 = vsel %vm732_vm4, %v743_v10, %v623_v60  ;;  %v739_v58 = vsel %vm738_vm7, %v737_v46, %v493_v12  ;;  %vm751_vm9 = vcmp.gt.f32.partialorder %v309_v55, 0.0 }
  0x6e   : > { %v722_v45 = vrot.slane %v721_v35, 4  ;;  %v675_v51 = vadd.f32 %v674_v56, %v673_v63  ;;  %v745_v47 = vsel %vm734_vm5, %v744_v39, %v649_v11  ;;  %v741_v13 = vsel %vm740_vm8, %v739_v58, %v519_v52 }
  0x6f   : > { %v699_v9 = vadd.f32 %v698_v42, %v697_v38  ;;  %v749_v2 = vmul.f32 0.17677669, %v741_v13  ;;  %vm752_vm10 = vcmp.gt.f32.partialorder %v310_v37, 0.0 }
  0x70   : > { %v723_v41 = vadd.f32 %v722_v45, %v721_v35  ;;  %v746_v1 = vsel %vm736_vm6, %v745_v47, %v675_v51 }
  0x71   : > { %v700_v29 = vrot.slane %v699_v9, 1  ;;  %v753_v36 = vsel %vm751_vm9, %v749_v2, -1e+09 }
  0x72   : > { %v724_v31 = vrot.slane %v723_v41, 2  ;;  %v755_v21 = vsel %vm321_vm0, %v753_v36, -inf }
  0x73   : > { %v701_v0 = vadd.f32 %v700_v29, %v699_v9 }
  0x74   : > { %v725_v32 = vadd.f32 %v724_v31, %v723_v41 }
  0x75   : > { %v747_v4 = vsel %vm738_vm7, %v746_v1, %v701_v0  ;;  %v792_v0 = vlaneseq }
  0x76   : > { %v726_v3 = vrot.slane %v725_v32, 1 }
  0x78   : > { %v727_v26 = vadd.f32 %v726_v3, %v725_v32 }
  0x7a   : > { %v748_v20 = vsel %vm740_vm8, %v747_v4, %v727_v26 }
  0x7b   : > { %v750_v44 = vmul.f32 0.17677669, %v748_v20 }
  0x7d   : > { %v754_v43 = vsel %vm752_vm10, %v750_v44, -1e+09 }
  0x7e   : > { %v756_v50 = vsel %vm321_vm0, %v754_v43, -inf }
  0x7f   : > { %v757_v60 = vmax.f32 %v755_v21, %v756_v50 }
  0x81   : > { %v758_v63 = vrot.slane %v757_v60, 4 }
  0x83   : > { %v759_v30 = vmax.f32 %v757_v60, %v758_v63  ;;  %v1357_v60 = vld [vmem:[%s1675_s11 + $0x48] sm:$0x7] }
  0x85   : > { %v760_v62 = vrot.slane %v759_v30, 2 }
  0x87   : > { %v761_v12 = vmax.f32 %v759_v30, %v760_v62 }
  0x89   : > { %v762_v22 = vrot.slane %v761_v12, 1 }
  0x8b   : > { %v763_v10 = vmax.f32 %v761_v12, %v762_v22 }
  0x8d   : > { %v764_v56 = vsub.f32 %v753_v36, %v763_v10  ;;  %v765_v38 = vsub.f32 %v754_v43, %v763_v10  ;;  %v791_v43 = vld [vmem:[%s1675_s11 + $0x20] sm:$0x7] }
  0x8f   : > { %v766_v35 = vmul.f32 1.442695, %v764_v56  ;;  %v768_v57 = vmul.f32 1.442695, %v765_v38 }
  0x91   : > { %1494 = vpow2.f32 %v766_v35 }
  0x92   : > { %1496 = vpow2.f32 %v768_v57 }
  0x9e   : > { %v1495_v11 = vpop.eup %1494 }
  0x9f   : > { %v1497_v46 = vpop.eup %1496  ;;  %v770_v52 = vmul.f32 %v1495_v11, %v309_v55  ;;  %v2177_v55 = vshrl.u32 %v792_v0, 7 }
  0xa0   : > { %v771_v42 = vmul.f32 %v1497_v46, %v310_v37 }
  0xa1   : > { %v772_v45 = vsel %vm321_vm0, %v770_v52, 0.0  ;;  %v794_v32 = vsub.s32 0, %v2177_v55  ;;  %v808_v1 = vsub.s32 1, %v2177_v55  ;;  %v827_v2 = vsub.s32 2, %v2177_v55 }
  0xa2   : > { %v773_v39 = vsel %vm321_vm0, %v771_v42, 0.0  ;;  %v846_v3 = vsub.s32 3, %v2177_v55  ;;  %v865_v4 = vsub.s32 4, %v2177_v55  ;;  %v884_v26 = vsub.s32 5, %v2177_v55 }
  0xa3   : > { %v774_v58 = vadd.f32 %v773_v39, %v772_v45  ;;  %v903_v36 = vsub.s32 6, %v2177_v55  ;;  %v922_v20 = vsub.s32 7, %v2177_v55 }
  0xa5   : > { %v775_v51 = vrot.slane %v774_v58, 4 }
  0xa7   : > { %v776_v9 = vadd.f32 %v775_v51, %v774_v58 }
  0xa9   : > { %v777_v41 = vrot.slane %v776_v9, 2 }
  0xab   : > { %v778_v47 = vadd.f32 %v777_v41, %v776_v9 }
  0xad   : > { %v779_v29 = vrot.slane %v778_v47, 1 }
  0xaf   : > { %v780_v31 = vadd.f32 %v779_v29, %v778_v47 }
  0xb1   : > { %v781_v13 = vadd.f32 1e-08, %v780_v31 }
  0xb3   : > { %1498 = vrcp.f32 %v781_v13 }
  0xc0   : > { %v1499_v37 = vpop.eup %1498 }
  0xc1   : > { %v783_v44 = vmul.f32 %v1499_v37, %v770_v52  ;;  %v2195_v21 = vmul.f32 %v1499_v37, %v771_v42 }
  0xc3   : > { %785 = vst.msk [vmem:[%s271_s5] sm:$0xff] %vm321_vm0, %v783_v44  ;;  %786 = vst.msk [vmem:[%s271_s5 + $0x8] sm:$0xff] %vm321_vm0, %v2195_v21  ;;  %v795_v50 = vrot.slane %v783_v44, %v794_v32  ;;  %v809_v63 = vrot.slane %v783_v44, %v808_v1  ;;  %v828_v30 = vrot.slane %v783_v44, %v827_v2 }
  0xc4   : > { %v2210_v62 = vrot.slane %v783_v44, %v846_v3  ;;  %v2214_v12 = vrot.slane %v783_v44, %v865_v4  ;;  %v2218_v22 = vrot.slane %v783_v44, %v884_v26  ;;  %v2222_v10 = vrot.slane %v783_v44, %v903_v36 }
  0xc5   : > { %v2226_v56 = vrot.slane %v783_v44, %v922_v20 }
  0xc6   : > { %1513 = shalt.err (!%p1510_p5)
}
  0xc7   : > { %s1514_s21 = scalar_lea.hbm %s2191_s8, 256  ;;  %s1518_s26 = scalar_lea.hbm %s2416_s4, 512 }
  0xc8   : > { %p1515_p6 = scmp.ne.s32.totalorder %s2191_s8, %s1514_s21  ;;  %p1519_p10 = scmp.lt.s32.totalorder %s2191_s8, %s2416_s4 }
  0xc9   : > { %p1520_p11 = scmp.lt.s32.totalorder %s1518_s26, %s1514_s21 }
  0xca   : > { %p1516_p7 = pnand %p1515_p6, %p1646_p4 }
  0xcb   : > { %p1521_p12 = por %p1520_p11, %p1519_p10 }
  0xcc   : > { %p1517_p9 = pneg %p1516_p7 }
  0xce   : > { %p1522_p13 = pnand %p1521_p12, %p1517_p9 }
  0xd0   : > { %1525 = shalt.err (!%p1522_p13)
}
  0xd1   : > { %s1579_s7 = smov 128   ;;  %s1580_s10 = smov 8   ;;  %v796_v38 = vmul.f32 %v795_v50, %v1688_v5  ;;  %v797_v35 = vmul.f32 %v795_v50, %v1691_v6  ;;  %v798_v57 = vmul.f32 %v795_v50, %v1694_v7  ;;  %v799_v11 = vmul.f32 %v795_v50, %v1697_v8  ;;  %v1362_v39 = vld [vmem:[%s1675_s11 + $0x70] sm:$0x7]  ;;  %v1372_v44 = vld [vmem:[%s1675_s11 + $0xc0] sm:$0x7] }
  0xd2   : > { %1437 = dma.vmem_to_hbm [thread:$0]  (%p1646_p4), %s2193_s6, 256, %s2191_s8, %s2230_s9, %s1579_s7, %s1579_s7, %s1580_s10   ;;  %v800_v46 = vmul.f32 %v795_v50, %v791_v43  ;;  %v810_v52 = vmul.f32 %v1709_v14, %v809_v63  ;;  %v811_v42 = vmul.f32 %v1712_v15, %v809_v63  ;;  %v812_v45 = vmul.f32 %v1717_v18, %v809_v63 }
  0xd3   : > { %v813_v58 = vmul.f32 %v1720_v19, %v809_v63  ;;  %v814_v51 = vmul.f32 %v1357_v60, %v809_v63  ;;  %v829_v5 = vmul.f32 %v1733_v27, %v828_v30  ;;  %v830_v6 = vmul.f32 %v1736_v28, %v828_v30  ;;  %v1367_v18 = vld [vmem:[%s1675_s11 + $0x98] sm:$0x7]  ;;  %s303_s8 = scalar_lea.vmem %s2415_s3, %s1435_s30 }
  0xd4   : > { %v815_v9 = vadd.f32 %v810_v52, %v796_v38  ;;  %v816_v7 = vadd.f32 %v811_v42, %v797_v35  ;;  %v817_v8 = vadd.f32 %v812_v45, %v798_v57  ;;  %v831_v41 = vmul.f32 %v1743_v33, %v828_v30  ;;  %v1377_v35 = vld [vmem:[%s1675_s11 + $0xe8] sm:$0x7]  ;;  %v1382_v45 = vld [vmem:[%s1675_s11 + $0x110] sm:$0x7] }
  0xd5   : > { %v818_v14 = vadd.f32 %v813_v58, %v799_v11  ;;  %v819_v47 = vadd.f32 %v814_v51, %v800_v46  ;;  %v832_v15 = vmul.f32 %v1746_v34, %v828_v30  ;;  %v833_v29 = vmul.f32 %v1362_v39, %v828_v30  ;;  %v2500_v51 = vld [vmem:[#allocation6_spill] sm:$0xff] }
  0xd6   : > { %v834_v31 = vadd.f32 %v829_v5, %v815_v9  ;;  %v835_v13 = vadd.f32 %v830_v6, %v816_v7  ;;  %v836_v19 = vadd.f32 %v831_v41, %v817_v8  ;;  %v848_v27 = vmul.f32 %v1755_v40, %v2210_v62  ;;  %v2501_v9 = vld [vmem:[#allocation7_spill] sm:$0xff] }
  0xd7   : > { %v837_v0 = vadd.f32 %v832_v15, %v818_v14  ;;  %v838_v28 = vadd.f32 %v833_v29, %v819_v47  ;;  %v849_v37 = vmul.f32 %v1767_v49, %v2210_v62  ;;  %v850_v33 = vmul.f32 %v1771_v53, %v2210_v62  ;;  %v2503_v14 = vld [vmem:[#allocation9_spill] sm:$0xff]  ;;  %v1387_v15 = vld [vmem:[%s1675_s11 + $0x138] sm:$0x7] }
  0xd8   : > { %v851_v34 = vmul.f32 %v1774_v54, %v2210_v62  ;;  %v852_v43 = vmul.f32 %v1367_v18, %v2210_v62  ;;  %v853_v50 = vadd.f32 %v848_v27, %v834_v31  ;;  %v867_v60 = vmul.f32 %v1792_v16, %v2214_v12 }
  0xd9   : > { %v854_v40 = vadd.f32 %v849_v37, %v835_v13  ;;  %v855_v63 = vadd.f32 %v850_v33, %v836_v19  ;;  %v868_v30 = vmul.f32 %v1796_v23, %v2214_v12  ;;  %v869_v49 = vmul.f32 %v1799_v24, %v2214_v12  ;;  %v2504_v13 = vld [vmem:[#allocation10_spill] sm:$0xff]  ;;  %v2506_v33 = vld [vmem:[#allocation12_spill] sm:$0xff] }
  0xda   : > { %v856_v53 = vadd.f32 %v851_v34, %v837_v0  ;;  %v857_v38 = vadd.f32 %v852_v43, %v838_v28  ;;  %v870_v54 = vmul.f32 %v1802_v25, %v2214_v12  ;;  %v871_v62 = vmul.f32 %v1372_v44, %v2214_v12  ;;  %v2499_v25 = vld [vmem:[#allocation5_spill] sm:$0xff]  ;;  %v2505_v28 = vld [vmem:[#allocation11_spill] sm:$0xff] }
  0xdb   : > { %v872_v57 = vadd.f32 %v867_v60, %v853_v50  ;;  %v873_v11 = vadd.f32 %v868_v30, %v854_v40  ;;  %v874_v16 = vadd.f32 %v869_v49, %v855_v63  ;;  %v886_v46 = vmul.f32 %v1818_v48, %v2218_v22  ;;  %v2507_v34 = vld [vmem:[#allocation13_spill] sm:$0xff] }
  0xdc   : > { %v875_v52 = vadd.f32 %v870_v54, %v856_v53  ;;  %v876_v42 = vadd.f32 %v871_v62, %v857_v38  ;;  %v887_v23 = vmul.f32 %v1824_v59, %v2218_v22  ;;  %v888_v24 = vmul.f32 %v1827_v61, %v2218_v22  ;;  %v2502_v59 = vld [vmem:[#allocation8_spill] sm:$0xff]  ;;  %v1392_v60 = vld [vmem:[%s1675_s11 + $0x160] sm:$0x7]  ;;  %v2508_v62 = vld [vmem:[#allocation14_spill] sm:$0xff] }
  0xdd   : > { %v889_v12 = vmul.f32 %v2499_v25, %v2218_v22  ;;  %v890_v39 = vmul.f32 %v1377_v35, %v2218_v22  ;;  %v891_v58 = vadd.f32 %v886_v46, %v872_v57  ;;  %v905_v5 = vmul.f32 %v2500_v51, %v2222_v10  ;;  %v2509_v35 = vld [vmem:[#allocation15_spill] sm:$0xff] }
  0xde   : > { %v892_v48 = vadd.f32 %v887_v23, %v873_v11  ;;  %v893_v6 = vadd.f32 %v888_v24, %v874_v16  ;;  %v906_v7 = vmul.f32 %v2501_v9, %v2222_v10  ;;  %v907_v8 = vmul.f32 %v2502_v59, %v2222_v10  ;;  %v2510_v11 = vld [vmem:[#allocation16_spill] sm:$0xff]  ;;  %v2512_v23 = vld [vmem:[#allocation18_spill] sm:$0xff]  ;;  %v2513_v25 = vld [vmem:[#allocation19_spill] sm:$0xff] }
  0xdf   : > { %v894_v41 = vadd.f32 %v889_v12, %v875_v52  ;;  %v895_v61 = vadd.f32 %v890_v39, %v876_v42  ;;  %v908_v47 = vmul.f32 %v2503_v14, %v2222_v10  ;;  %v909_v22 = vmul.f32 %v1382_v45, %v2222_v10  ;;  %v1397_v42 = vld [vmem:[%s1675_s11 + $0x188] sm:$0x7]  ;;  %v1402_v9 = vld [vmem:[%s1675_s11 + $0x1b0] sm:$0x7] }
  0xe0   : > { %v910_v29 = vadd.f32 %v905_v5, %v891_v58  ;;  %v911_v18 = vadd.f32 %v906_v7, %v892_v48  ;;  %v912_v31 = vadd.f32 %v907_v8, %v893_v6  ;;  %v924_v19 = vmul.f32 %v2504_v13, %v2226_v56  ;;  %v2515_v48 = vld [vmem:[#allocation21_spill] sm:$0xff] }
  0xe1   : > { %v913_v27 = vadd.f32 %v908_v47, %v894_v41  ;;  %v914_v0 = vadd.f32 %v909_v22, %v895_v61  ;;  %v925_v37 = vmul.f32 %v2505_v28, %v2226_v56  ;;  %v926_v44 = vmul.f32 %v2506_v33, %v2226_v56  ;;  %v2516_v41 = vld [vmem:[#allocation22_spill] sm:$0xff]  ;;  %v2517_v22 = vld [vmem:[#allocation23_spill] sm:$0xff]  ;;  %v2519_v13 = vld [vmem:[#allocation25_spill] sm:$0xff] }
  0xe2   : > { %v927_v43 = vmul.f32 %v2507_v34, %v2226_v56  ;;  %v928_v10 = vmul.f32 %v1387_v15, %v2226_v56  ;;  %v929_v50 = vadd.f32 %v924_v19, %v910_v29  ;;  %v942_v40 = vrot.slane %v2195_v21, %v794_v32  ;;  %v2511_v32 = vld [vmem:[#allocation17_spill] sm:$0xff]  ;;  %v2518_v29 = vld [vmem:[#allocation24_spill] sm:$0xff] }
  0xe3   : > { %v930_v63 = vadd.f32 %v925_v37, %v911_v18  ;;  %v931_v30 = vadd.f32 %v926_v44, %v912_v31  ;;  %v961_v49 = vrot.slane %v2195_v21, %v808_v1  ;;  %v980_v53 = vrot.slane %v2195_v21, %v827_v2  ;;  %v2514_v2 = vld [vmem:[#allocation20_spill] sm:$0xff] }
  0xe4   : > { %v932_v38 = vadd.f32 %v927_v43, %v913_v27  ;;  %v933_v54 = vadd.f32 %v928_v10, %v914_v0  ;;  %v943_v56 = vmul.f32 %v2508_v62, %v942_v40  ;;  %v944_v57 = vmul.f32 %v2509_v35, %v942_v40  ;;  %v1407_v33 = vld [vmem:[%s1675_s11 + $0x1d8] sm:$0x7] }
  0xe5   : > { %v945_v16 = vmul.f32 %v2510_v11, %v942_v40  ;;  %v946_v46 = vmul.f32 %v2511_v32, %v942_v40  ;;  %v947_v52 = vmul.f32 %v1392_v60, %v942_v40  ;;  %v962_v24 = vmul.f32 %v2512_v23, %v961_v49  ;;  %v2520_v40 = vld [vmem:[#allocation26_spill] sm:$0xff]  ;;  %v2527_v23 = vld [vmem:[#allocation33_spill] sm:$0xff] }
  0xe6   : > { %v948_v1 = vadd.f32 %v943_v56, %v929_v50  ;;  %v949_v45 = vadd.f32 %v944_v57, %v930_v63  ;;  %v963_v12 = vmul.f32 %v2513_v25, %v961_v49  ;;  %v964_v39 = vmul.f32 %v2514_v2, %v961_v49  ;;  %v2524_v56 = vld [vmem:[#allocation30_spill] sm:$0xff]  ;;  %v2525_v57 = vld [vmem:[#allocation31_spill] sm:$0xff] }
  0xe7   : > { %v950_v58 = vadd.f32 %v945_v16, %v931_v30  ;;  %v951_v51 = vadd.f32 %v946_v46, %v932_v38  ;;  %v952_v5 = vadd.f32 %v947_v52, %v933_v54  ;;  %v965_v6 = vmul.f32 %v2515_v48, %v961_v49  ;;  %v2521_v30 = vld [vmem:[#allocation27_spill] sm:$0xff]  ;;  %v2523_v38 = vld [vmem:[#allocation29_spill] sm:$0xff]  ;;  %v2528_v25 = vld [vmem:[#allocation34_spill] sm:$0xff] }
  0xe8   : > { %v966_v7 = vmul.f32 %v1397_v42, %v961_v49  ;;  %v967_v59 = vadd.f32 %v962_v24, %v948_v1  ;;  %v968_v8 = vadd.f32 %v963_v12, %v949_v45  ;;  %v981_v61 = vmul.f32 %v2516_v41, %v980_v53  ;;  %v1417_v45 = vld [vmem:[%s1675_s11 + $0x228] sm:$0x7]  ;;  %v1422_v41 = vld [vmem:[%s1675_s11 + $0x250] sm:$0x7] }
  0xe9   : > { %v969_v14 = vadd.f32 %v964_v39, %v950_v58  ;;  %v970_v47 = vadd.f32 %v965_v6, %v951_v51  ;;  %v982_v15 = vmul.f32 %v2517_v22, %v980_v53  ;;  %v983_v18 = vmul.f32 %v2518_v29, %v980_v53  ;;  %v2529_v51 = vld [vmem:[#allocation35_spill] sm:$0xff]  ;;  %v2532_v22 = vld [vmem:[#allocation38_spill] sm:$0xff] }
  0xea   : > { %v971_v31 = vadd.f32 %v966_v7, %v952_v5  ;;  %v984_v19 = vmul.f32 %v2519_v13, %v980_v53  ;;  %v985_v27 = vmul.f32 %v1402_v9, %v980_v53  ;;  %v986_v0 = vadd.f32 %v981_v61, %v967_v59  ;;  %v2530_v9 = vld [vmem:[#allocation36_spill] sm:$0xff]  ;;  %v2531_v59 = vld [vmem:[#allocation37_spill] sm:$0xff] }
  0xeb   : > { %v987_v28 = vadd.f32 %v982_v15, %v968_v8  ;;  %v988_v37 = vadd.f32 %v983_v18, %v969_v14  ;;  %v999_v44 = vrot.slane %v2195_v21, %v846_v3  ;;  %v1018_v34 = vrot.slane %v2195_v21, %v865_v4  ;;  %v2522_v3 = vld [vmem:[#allocation28_spill] sm:$0xff]  ;;  %v1412_v4 = vld [vmem:[%s1675_s11 + $0x200] sm:$0x7] }
  0xec   : > { %v989_v43 = vadd.f32 %v984_v19, %v970_v47  ;;  %v990_v10 = vadd.f32 %v985_v27, %v971_v31  ;;  %v1037_v50 = vrot.slane %v2195_v21, %v884_v26  ;;  %v1056_v60 = vrot.slane %v2195_v21, %v903_v36  ;;  %v2526_v26 = vld [vmem:[#allocation32_spill] sm:$0xff]  ;;  %v2533_v31 = vld [vmem:[#allocation39_spill] sm:$0xff] }
  0xed   : > { %v1000_v63 = vmul.f32 %v2520_v40, %v999_v44  ;;  %v1001_v49 = vmul.f32 %v2521_v30, %v999_v44  ;;  %v1002_v53 = vmul.f32 %v2522_v3, %v999_v44  ;;  %v1003_v54 = vmul.f32 %v2523_v38, %v999_v44  ;;  %v2534_v19 = vld [vmem:[#allocation40_spill] sm:$0xff]  ;;  %v2536_v30 = vld [vmem:[#allocation42_spill] sm:$0xff]  ;;  %v2537_v3 = vld [vmem:[#allocation43_spill] sm:$0xff] }
  0xee   : > { %v1004_v62 = vmul.f32 %v1407_v33, %v999_v44  ;;  %v1019_v35 = vmul.f32 %v2524_v56, %v1018_v34  ;;  %v1020_v11 = vmul.f32 %v2525_v57, %v1018_v34  ;;  %v1021_v16 = vmul.f32 %v2526_v26, %v1018_v34  ;;  %v2538_v38 = vld [vmem:[#allocation44_spill] sm:$0xff] }
  0xef   : > { %v1005_v32 = vadd.f32 %v1000_v63, %v986_v0  ;;  %v1006_v46 = vadd.f32 %v1001_v49, %v987_v28  ;;  %v1007_v36 = vadd.f32 %v1002_v53, %v988_v37  ;;  %v1008_v52 = vadd.f32 %v1003_v54, %v989_v43  ;;  %v2535_v28 = vld [vmem:[#allocation41_spill] sm:$0xff] }
  0xf0   : > { %v1009_v42 = vadd.f32 %v1004_v62, %v990_v10  ;;  %v1022_v24 = vmul.f32 %v2527_v23, %v1018_v34  ;;  %v1023_v1 = vmul.f32 %v1412_v4, %v1018_v34  ;;  %v1038_v12 = vmul.f32 %v2528_v25, %v1037_v50  ;;  %v1427_v10 = vld [vmem:[%s1675_s11 + $0x278] sm:$0x7] }
  0xf1   : > { %v1024_v2 = vadd.f32 %v1019_v35, %v1005_v32  ;;  %v1025_v39 = vadd.f32 %v1020_v11, %v1006_v46  ;;  %v1026_v58 = vadd.f32 %v1021_v16, %v1007_v36  ;;  %v1039_v5 = vmul.f32 %v2529_v51, %v1037_v50 }
  0xf2   : > { %v1027_v48 = vadd.f32 %v1022_v24, %v1008_v52  ;;  %v1028_v6 = vadd.f32 %v1023_v1, %v1009_v42  ;;  %v1040_v7 = vmul.f32 %v2530_v9, %v1037_v50  ;;  %v1041_v8 = vmul.f32 %v2531_v59, %v1037_v50 }
  0xf3   : > { %v1042_v61 = vmul.f32 %v1417_v45, %v1037_v50  ;;  %v1043_v14 = vadd.f32 %v1038_v12, %v1024_v2  ;;  %v1044_v47 = vadd.f32 %v1039_v5, %v1025_v39  ;;  %v1057_v15 = vmul.f32 %v2532_v22, %v1056_v60 }
  0xf4   : > { %v1045_v29 = vadd.f32 %v1040_v7, %v1026_v58  ;;  %v1046_v18 = vadd.f32 %v1041_v8, %v1027_v48  ;;  %v1058_v13 = vmul.f32 %v2533_v31, %v1056_v60  ;;  %v1059_v27 = vmul.f32 %v2534_v19, %v1056_v60 }
  0xf5   : > { %v1047_v0 = vadd.f32 %v1042_v61, %v1028_v6  ;;  %v1060_v37 = vmul.f32 %v2535_v28, %v1056_v60  ;;  %v1061_v33 = vmul.f32 %v1422_v41, %v1056_v60  ;;  %v1062_v44 = vadd.f32 %v1057_v15, %v1043_v14 }
  0xf6   : > { %v1063_v34 = vadd.f32 %v1058_v13, %v1044_v47  ;;  %v1064_v43 = vadd.f32 %v1059_v27, %v1045_v29  ;;  %v1075_v50 = vrot.slane %v2195_v21, %v922_v20 }
  0xf7   : > { %v1065_v40 = vadd.f32 %v1060_v37, %v1046_v18  ;;  %v1066_v63 = vadd.f32 %v1061_v33, %v1047_v0 }
  0xf8   : > { %v1076_v49 = vmul.f32 %v2536_v30, %v1075_v50  ;;  %v1077_v53 = vmul.f32 %v2537_v3, %v1075_v50  ;;  %v1078_v54 = vmul.f32 %v2538_v38, %v1075_v50  ;;  %v1079_v4 = vmul.f32 %v2120_v17, %v1075_v50 }
  0xf9   : > { %v1080_v60 = vmul.f32 %v1427_v10, %v1075_v50 }
  0xfa   : > { %v1081_v62 = vadd.f32 %v1076_v49, %v1062_v44  ;;  %v1082_v55 = vadd.f32 %v1077_v53, %v1063_v34  ;;  %v1083_v56 = vadd.f32 %v1078_v54, %v1064_v43  ;;  %v1084_v20 = vadd.f32 %v1079_v4, %v1065_v40 }
  0xfb   : > { %v1085_v21 = vadd.f32 %v1080_v60, %v1066_v63 }
  0xfc   : > { %1086 = vst.msk [vmem:[%s303_s8] sm:$0xff] %vm321_vm0, %v1081_v62  ;;  %1087 = vst.msk [vmem:[%s303_s8 + $0x8] sm:$0xff] %vm321_vm0, %v1082_v55 }
  0xfd   : > { %1088 = vst.msk [vmem:[%s303_s8 + $0x10] sm:$0xff] %vm321_vm0, %v1083_v56  ;;  %1089 = vst.msk [vmem:[%s303_s8 + $0x18] sm:$0xff] %vm321_vm0, %v1084_v20 }
  0xfe   : > { %1090 = vst.msk [vmem:[%s303_s8 + $0x20] sm:$0x7] %vm329_vm1, %v1085_v21 }
  0xff PF: > { %p1443_p4 = scmp.ge.s32.totalorder %s1576_s20, 2  ;;  %s1143_s29 = sand.u32 1, %s1556_s15  }
 0x100   : > { %s1144_s30 = scalar_lea.sflag [#allocation3], %s1143_s29 }
 0x101   : > { %p1440_p0 = pnand %p1443_p4, %p1653_p8 }
 0x103   : > { %p1441_p1 = pneg %p1440_p0 }
 0x105   : > { %1551 = dma.done.wait (%p1441_p1), %s1144_s30, 256  }
 0x106   : > { %1553 = vsyncadd (%p1441_p1), %s1144_s30, 4294967040  ;;  %s18_s20 = sadd.s32 1, %s1576_s20   ;;  %s2539_s15 = smov %s1560_s16 }
 0x107   : > { %p15_p2 = scmp.ge.s32.totalorder %s18_s20, 4   ;;  %s2540_s16 = smov %s1564_s17 }
 0x108   : > { %s2541_s17 = smov %s1659_s28  ;;  %s2542_s18 = smov %s1572_s19 }
 0x109   : > { %s2543_s19 = smov %s2545_s23  ;;  %17 = sbr.rel (!%p15_p2) target bundleno = 4 (0x4), region = 100 }
 0x10e   :  { %1149 = vsyncpa [#allocation3], 1 }
 0x10f   :  { %1151 = vsyncpa [#allocation3 + $0x1], 1 }

</bundles_post_ra>
